<compile_context>
chip_gen: v7x
topology: tpu7x:2x2x1
jax: 0.10.0
libtpu: 0.0.40
codegen_flags: <defaults>
</compile_context>

<pallas_src>
import jax
import jax.numpy as jnp
import numpy as np
from jax.experimental import pallas as pl
from jax.experimental.pallas import tpu as pltpu


# ----------------------------------------------------------------------------
# Kernel factory: one fused residual block over NB images per grid step.
# ----------------------------------------------------------------------------
def _make_kernel(NB, Ho, Wo, Cin, Cout, stride, Hph, has_projection):
    R = NB * Ho * Wo
    s = stride

    def kernel(xph_ref, w1_ref, w2_ref, b_ref, out_ref, p1_ref, hp_ref, p2_ref):
        # ---- conv1 im2col: stage the 9 taps into p1_ref (R, 9*Cin), bf16 ----
        # Tap (dy,dx) at output (i,j) reads padded-x[s*i+dy, s*j+dx], which is
        # a contiguous slice of phase (dy%s, dx%s) of the stride-decomposed
        # input (phases are stacked along rows of xph_ref).
        t = 0
        for dy in range(3):
            for dx in range(3):
                ph = (dy % s) * s + (dx % s)
                r0 = ph * Hph + dy // s
                c0 = dx // s
                tap = xph_ref[:, r0:r0 + Ho, c0:c0 + Wo, :]        # (NB,Ho,Wo,Cin)
                p1_ref[:, t * Cin:(t + 1) * Cin] = tap.reshape(R, Cin)
                t += 1

        # ---- conv1 (+ folded projection shortcut): one stacked matmul -------
        # w1_ref is (9*Cin, 2*Cout) when a projection shortcut exists
        # (cols [Cout:2*Cout] hold the 1x1 shortcut weight on the centre tap),
        # else (9*Cin, Cout).  BN scales are pre-folded into the weights.
        res = jnp.dot(p1_ref[...], w1_ref[...],
                      preferred_element_type=jnp.float32)           # (R, Wn)
        h = jnp.maximum(res[:, :Cout] + b_ref[0:1, :], 0.0)         # BN1 shift + ReLU

        # ---- stage conv1 output into zero-padded bf16 VMEM scratch ----------
        h4 = h.astype(jnp.bfloat16).reshape(NB, Ho, Wo, Cout)
        hp_ref[:, 0:1, :, :] = jnp.zeros((NB, 1, Wo + 2, Cout), jnp.bfloat16)
        hp_ref[:, Ho + 1:Ho + 2, :, :] = jnp.zeros((NB, 1, Wo + 2, Cout), jnp.bfloat16)
        hp_ref[:, 1:Ho + 1, 0:1, :] = jnp.zeros((NB, Ho, 1, Cout), jnp.bfloat16)
        hp_ref[:, 1:Ho + 1, Wo + 1:Wo + 2, :] = jnp.zeros((NB, Ho, 1, Cout), jnp.bfloat16)
        hp_ref[:, 1:Ho + 1, 1:Wo + 1, :] = h4

        # ---- conv2 im2col: stage the 9 taps into p2_ref (R, 9*Cout), bf16 ---
        t = 0
        for dy in range(3):
            for dx in range(3):
                p2_ref[:, t * Cout:(t + 1) * Cout] = \
                    hp_ref[:, dy:dy + Ho, dx:dx + Wo, :].reshape(R, Cout)
                t += 1

        # ---- conv2: one stacked-K matmul + BN2 shift ------------------------
        out2 = jnp.dot(p2_ref[...], w2_ref[...],
                       preferred_element_type=jnp.float32) + b_ref[1:2, :]

        # ---- shortcut --------------------------------------------------------
        if has_projection:
            sc = res[:, Cout:2 * Cout] + b_ref[2:3, :]
        else:
            # identity shortcut: the centre im2col tap of conv1 is exactly x
            sc = p1_ref[:, 4 * Cin:5 * Cin].astype(jnp.float32)

        # ---- residual add + ReLU --------------------------------------------
        out_ref[...] = jnp.maximum(out2 + sc, 0.0).reshape(NB, Ho, Wo, Cout)

    return kernel


# ----------------------------------------------------------------------------
# Tiling / VMEM helpers.
# ----------------------------------------------------------------------------
def _choose_nb(N, rows_per_img, target_rows=1024):
    """Images per grid step: ~target_rows MXU rows/step, prefer >=4 grid steps
    (2 per TensorCore on v7x) so block DMAs overlap compute."""
    target = max(1, target_rows // rows_per_img)
    divisors = [d for d in range(1, N + 1) if N % d == 0]
    for min_steps in (4, 2, 1):
        cands = [d for d in divisors if d <= target and N // d >= min_steps]
        if cands:
            return max(cands)
    return 1


def _vmem_cap_bytes():
    """~85% of the real per-core VMEM (128 MiB on v5e/v6e, 64 MiB on v7x);
    conservative fallback that is safe on every generation."""
    try:
        info = pltpu.get_tpu_info()
        cap = getattr(info, "vmem_capacity_bytes", None)
        if cap:
            return int(cap * 0.85)
    except Exception:
        pass
    return 48 * 2 ** 20


# ----------------------------------------------------------------------------
# Wrapper: NCHW in / NCHW out.  Phase decomposition + BN folding are XLA glue.
# ----------------------------------------------------------------------------
def residual_block(x_nchw, params, stride):
    w1, w2, ws, s1, b1, s2, b2, ss, bs = params
    has_projection = ws is not None
    assert stride in (1, 2), "CIFAR ResNet blocks use stride 1 or 2"

    N, Cin, H, W = x_nchw.shape
    Cout = w1.shape[0]                       # PyTorch layout (Cout, Cin, 3, 3)
    Ho = (H + 2 - 3) // stride + 1
    Wo = (W + 2 - 3) // stride + 1

    x_nhwc = jnp.transpose(x_nchw, (0, 2, 3, 1)).astype(jnp.float32)
    xp = jnp.pad(x_nhwc, ((0, 0), (1, 1), (1, 1), (0, 0)))

    # ---- stride-phase decomposition of the padded input (no 9x expansion) ---
    n_ph = stride * stride
    Hph = Ho + 2 // stride
    Wph = Wo + 2 // stride
    phases = []
    for a in range(stride):
        for b in range(stride):
            p = xp[:, a::stride, b::stride, :][:, :Hph, :Wph, :]
            pad_h, pad_w = Hph - p.shape[1], Wph - p.shape[2]
            if pad_h or pad_w:
                p = jnp.pad(p, ((0, 0), (0, pad_h), (0, pad_w), (0, 0)))
            phases.append(p)
    xph = jnp.stack(phases, axis=1).reshape(N, n_ph * Hph, Wph, Cin)
    xph = xph.astype(jnp.bfloat16)

    # ---- fold BN scales into weights; fold the shortcut into conv1 ----------
    w1_mat = jnp.transpose(w1, (2, 3, 1, 0)).reshape(9 * Cin, Cout) * s1[None, :]
    w2_mat = (jnp.transpose(w2, (2, 3, 1, 0)).reshape(9 * Cout, Cout)
              * s2[None, :]).astype(jnp.bfloat16)
    if has_projection:
        ws_mat = ws[:, :, 0, 0].T * ss[None, :]                      # (Cin, Cout)
        w_sc = jnp.zeros((9 * Cin, Cout), jnp.float32)
        w_sc = w_sc.at[4 * Cin:5 * Cin, :].set(ws_mat)               # centre-tap rows
        w1c = jnp.concatenate([w1_mat, w_sc], axis=1).astype(jnp.bfloat16)
        bias = jnp.stack([b1, b2, bs]).astype(jnp.float32)           # (3, Cout)
    else:
        w1c = w1_mat.astype(jnp.bfloat16)
        bias = jnp.stack([b1, b2, jnp.zeros_like(b1)]).astype(jnp.float32)

    # ---- tiling ---------------------------------------------------------------
    rows_per_img = Ho * Wo
    NB = _choose_nb(N, rows_per_img)
    R = NB * rows_per_img
    grid = (N // NB,)

    # ---- VMEM budget (double-buffered blocks + weights + scratch) ------------
    in_block = NB * n_ph * Hph * Wph * Cin * 2
    out_block = NB * rows_per_img * Cout * 4
    weight_bytes = (w1c.size + w2_mat.size) * 2 + bias.size * 4
    scratch_bytes = (R * 9 * Cin * 2
                     + NB * (Ho + 2) * (Wo + 2) * Cout * 2
                     + R * 9 * Cout * 2)
    est = 2 * (in_block + out_block) + weight_bytes + scratch_bytes
    vmem_limit = int(min(_vmem_cap_bytes(), max(16 * 2 ** 20, 2 * est)))

    kernel = _make_kernel(NB, Ho, Wo, Cin, Cout, stride, Hph, has_projection)

    out4 = pl.pallas_call(
        kernel,
        out_shape=jax.ShapeDtypeStruct((N, Ho, Wo, Cout), jnp.float32),
        grid_spec=pltpu.PrefetchScalarGridSpec(
            num_scalar_prefetch=0,
            grid=grid,
            in_specs=[
                pl.BlockSpec((NB, n_ph * Hph, Wph, Cin), lambda i: (i, 0, 0, 0)),
                pl.BlockSpec(w1c.shape, lambda i: (0, 0)),
                pl.BlockSpec(w2_mat.shape, lambda i: (0, 0)),
                pl.BlockSpec(bias.shape, lambda i: (0, 0)),
            ],
            out_specs=pl.BlockSpec((NB, Ho, Wo, Cout), lambda i: (i, 0, 0, 0)),
            scratch_shapes=[
                pltpu.VMEM((R, 9 * Cin), jnp.bfloat16),                  # conv1 patches
                pltpu.VMEM((NB, Ho + 2, Wo + 2, Cout), jnp.bfloat16),    # padded conv1 out
                pltpu.VMEM((R, 9 * Cout), jnp.bfloat16),                 # conv2 patches
            ],
        ),
        compiler_params=pltpu.CompilerParams(
            dimension_semantics=("parallel",),
            vmem_limit_bytes=vmem_limit),
    )(xph, w1c, w2_mat, bias)

    return jnp.transpose(out4, (0, 3, 1, 2))             # back to NCHW


# ----------------------------------------------------------------------------
# Deterministic parameter init (shapes from the nn.Module __init__).
# ----------------------------------------------------------------------------
def _bn_fold(kg, kb, km, kv, c):
    gamma = 1.0 + 0.1 * jax.random.normal(kg, (c,), jnp.float32)
    beta = 0.1 * jax.random.normal(kb, (c,), jnp.float32)
    mean = 0.05 * jax.random.normal(km, (c,), jnp.float32)
    var = 1.0 + 0.1 * jax.random.uniform(kv, (c,), jnp.float32)
    scale = gamma * jax.lax.rsqrt(var + 1e-5)
    shift = beta - mean * scale
    return scale, shift


def init_params(key, in_channels, out_channels, stride):
    ks = jax.random.split(key, 15)
    w1 = 0.1 * jax.random.normal(ks[0], (out_channels, in_channels, 3, 3),
                                 jnp.float32)
    w2 = 0.1 * jax.random.normal(ks[1], (out_channels, out_channels, 3, 3),
                                 jnp.float32)
    s1, b1 = _bn_fold(ks[2], ks[3], ks[4], ks[5], out_channels)
    s2, b2 = _bn_fold(ks[6], ks[7], ks[8], ks[9], out_channels)
    if stride != 1 or in_channels != out_channels:
        ws = 0.1 * jax.random.normal(ks[10], (out_channels, in_channels, 1, 1),
                                     jnp.float32)
        ss, bs = _bn_fold(ks[11], ks[12], ks[13], ks[14], out_channels)
    else:
        ws = ss = bs = None                   # identity shortcut (no matmul)
    return (w1, w2, ws, s1, b1, s2, b2, ss, bs)


# ----------------------------------------------------------------------------
# Pure-JAX reference (for correctness check only).
# ----------------------------------------------------------------------------
def residual_block_ref(x_nchw, params, stride):
    w1, w2, ws, s1, b1, s2, b2, ss, bs = params
    x = jnp.transpose(x_nchw, (0, 2, 3, 1)).astype(jnp.float32)

    def conv(inp, w_pt, s, pad):
        wh = jnp.transpose(w_pt, (2, 3, 1, 0))
        return jax.lax.conv_general_dilated(
            inp, wh, (s, s), ((pad, pad), (pad, pad)),
            dimension_numbers=('NHWC', 'HWIO', 'NHWC'))

    h = jax.nn.relu(conv(x, w1, stride, 1) * s1 + b1)
    o = conv(h, w2, 1, 1) * s2 + b2
    if ws is not None:
        sc = conv(x, ws, stride, 0) * ss + bs
    else:
        sc = x
    return jnp.transpose(jax.nn.relu(o + sc), (0, 3, 1, 2))


if __name__ == "__main__":
    # Downsample / projection-shortcut path.
    N, Cin, H, W = 2, 4, 16, 16
    Cout, stride = 8, 2
    x = jax.random.normal(jax.random.PRNGKey(0), (N, Cin, H, W), jnp.float32)
    params = init_params(jax.random.PRNGKey(1), Cin, Cout, stride)
    out = jax.block_until_ready(residual_block(x, params, stride))
    ref = jax.block_until_ready(residual_block_ref(x, params, stride))
    np.testing.assert_allclose(np.asarray(out), np.asarray(ref),
                               rtol=3e-2, atol=3e-2)

    # Identity-shortcut path (stride=1, Cin == Cout).
    N2, C2, H2 = 2, 8, 8
    x2 = jax.random.normal(jax.random.PRNGKey(2), (N2, C2, H2, H2),
                           jnp.float32)
    params2 = init_params(jax.random.PRNGKey(3), C2, C2, 1)
    out2 = jax.block_until_ready(residual_block(x2, params2, 1))
    ref2 = jax.block_until_ready(residual_block_ref(x2, params2, 1))
    np.testing.assert_allclose(np.asarray(out2), np.asarray(ref2),
                               rtol=3e-2, atol=3e-2)

    print("KERNEL_OK")
</pallas_src>

<mosaic_0001>
module attributes {stable_mosaic.version = 11 : i64} {
  func.func @kernel(%arg0: i32, %arg1: memref<1x36x9x4xbf16, #tpu.memory_space<vmem>>, %arg2: memref<36x16xbf16, #tpu.memory_space<vmem>>, %arg3: memref<72x8xbf16, #tpu.memory_space<vmem>>, %arg4: memref<3x8xf32, #tpu.memory_space<vmem>>, %arg5: memref<1x8x8x8xf32, #tpu.memory_space<vmem>>, %arg6: memref<64x36xbf16, #tpu.memory_space<vmem>>, %arg7: memref<1x10x10x8xbf16, #tpu.memory_space<vmem>>, %arg8: memref<64x72xbf16, #tpu.memory_space<vmem>>) attributes {dimension_semantics = [#tpu.dimension_semantics<parallel>], iteration_bounds = array<i64: 2>, scalar_prefetch = 0 : i64, scratch_operands = 3 : i64, tpu.core_type = #tpu.core_type<tc>, window_params = [{transform_indices = @transform_0, window_bounds = array<i64: 1, 36, 9, 4>}, {pipeline_mode = #tpu.pipeline_mode<synchronous>, transform_indices = @transform_1, window_bounds = array<i64: 36, 16>}, {pipeline_mode = #tpu.pipeline_mode<synchronous>, transform_indices = @transform_2, window_bounds = array<i64: 72, 8>}, {pipeline_mode = #tpu.pipeline_mode<synchronous>, transform_indices = @transform_3, window_bounds = array<i64: 3, 8>}, {transform_indices = @transform_4, window_bounds = array<i64: 1, 8, 8, 8>}]} {
    %c0 = arith.constant 0 : index
    %c0_0 = arith.constant 0 : index
    %c0_1 = arith.constant 0 : index
    %c0_2 = arith.constant 0 : index
    %0 = vector.load %arg1[%c0, %c0_0, %c0_1, %c0_2] : memref<1x36x9x4xbf16, #tpu.memory_space<vmem>>, vector<1x8x8x4xbf16>
    %1 = vector.shape_cast %0 : vector<1x8x8x4xbf16> to vector<64x4xbf16>
    %c0_3 = arith.constant 0 : index
    %c0_4 = arith.constant 0 : index
    %2 = vector.load %arg6[%c0_3, %c0_4] : memref<64x36xbf16, #tpu.memory_space<vmem>>, vector<64x4xbf16>
    tpu.vector_store %arg6[%c0_3, %c0_4], %1 {strides = array<i32>} : memref<64x36xbf16, #tpu.memory_space<vmem>>, vector<64x4xbf16>,
    %c0_5 = arith.constant 0 : index
    %c9 = arith.constant 9 : index
    %c0_6 = arith.constant 0 : index
    %c0_7 = arith.constant 0 : index
    %3 = vector.load %arg1[%c0_5, %c9, %c0_6, %c0_7] : memref<1x36x9x4xbf16, #tpu.memory_space<vmem>>, vector<1x8x8x4xbf16>
    %4 = vector.shape_cast %3 : vector<1x8x8x4xbf16> to vector<64x4xbf16>
    %c0_8 = arith.constant 0 : index
    %c4 = arith.constant 4 : index
    %5 = vector.load %arg6[%c0_8, %c4] : memref<64x36xbf16, #tpu.memory_space<vmem>>, vector<64x4xbf16>
    tpu.vector_store %arg6[%c0_8, %c4], %4 {strides = array<i32>} : memref<64x36xbf16, #tpu.memory_space<vmem>>, vector<64x4xbf16>,
    %c0_9 = arith.constant 0 : index
    %c0_10 = arith.constant 0 : index
    %c1 = arith.constant 1 : index
    %c0_11 = arith.constant 0 : index
    %6 = vector.load %arg1[%c0_9, %c0_10, %c1, %c0_11] : memref<1x36x9x4xbf16, #tpu.memory_space<vmem>>, vector<1x8x8x4xbf16>
    %7 = vector.shape_cast %6 : vector<1x8x8x4xbf16> to vector<64x4xbf16>
    %c0_12 = arith.constant 0 : index
    %c8 = arith.constant 8 : index
    %8 = vector.load %arg6[%c0_12, %c8] : memref<64x36xbf16, #tpu.memory_space<vmem>>, vector<64x4xbf16>
    tpu.vector_store %arg6[%c0_12, %c8], %7 {strides = array<i32>} : memref<64x36xbf16, #tpu.memory_space<vmem>>, vector<64x4xbf16>,
    %c0_13 = arith.constant 0 : index
    %c18 = arith.constant 18 : index
    %c0_14 = arith.constant 0 : index
    %c0_15 = arith.constant 0 : index
    %9 = vector.load %arg1[%c0_13, %c18, %c0_14, %c0_15] : memref<1x36x9x4xbf16, #tpu.memory_space<vmem>>, vector<1x8x8x4xbf16>
    %10 = vector.shape_cast %9 : vector<1x8x8x4xbf16> to vector<64x4xbf16>
    %c0_16 = arith.constant 0 : index
    %c12 = arith.constant 12 : index
    %11 = vector.load %arg6[%c0_16, %c12] : memref<64x36xbf16, #tpu.memory_space<vmem>>, vector<64x4xbf16>
    tpu.vector_store %arg6[%c0_16, %c12], %10 {strides = array<i32>} : memref<64x36xbf16, #tpu.memory_space<vmem>>, vector<64x4xbf16>,
    %c0_17 = arith.constant 0 : index
    %c27 = arith.constant 27 : index
    %c0_18 = arith.constant 0 : index
    %c0_19 = arith.constant 0 : index
    %12 = vector.load %arg1[%c0_17, %c27, %c0_18, %c0_19] : memref<1x36x9x4xbf16, #tpu.memory_space<vmem>>, vector<1x8x8x4xbf16>
    %13 = vector.shape_cast %12 : vector<1x8x8x4xbf16> to vector<64x4xbf16>
    %c0_20 = arith.constant 0 : index
    %c16 = arith.constant 16 : index
    %14 = vector.load %arg6[%c0_20, %c16] : memref<64x36xbf16, #tpu.memory_space<vmem>>, vector<64x4xbf16>
    tpu.vector_store %arg6[%c0_20, %c16], %13 {strides = array<i32>} : memref<64x36xbf16, #tpu.memory_space<vmem>>, vector<64x4xbf16>,
    %c0_21 = arith.constant 0 : index
    %c18_22 = arith.constant 18 : index
    %c1_23 = arith.constant 1 : index
    %c0_24 = arith.constant 0 : index
    %15 = vector.load %arg1[%c0_21, %c18_22, %c1_23, %c0_24] : memref<1x36x9x4xbf16, #tpu.memory_space<vmem>>, vector<1x8x8x4xbf16>
    %16 = vector.shape_cast %15 : vector<1x8x8x4xbf16> to vector<64x4xbf16>
    %c0_25 = arith.constant 0 : index
    %c20 = arith.constant 20 : index
    %17 = vector.load %arg6[%c0_25, %c20] : memref<64x36xbf16, #tpu.memory_space<vmem>>, vector<64x4xbf16>
    tpu.vector_store %arg6[%c0_25, %c20], %16 {strides = array<i32>} : memref<64x36xbf16, #tpu.memory_space<vmem>>, vector<64x4xbf16>,
    %c0_26 = arith.constant 0 : index
    %c1_27 = arith.constant 1 : index
    %c0_28 = arith.constant 0 : index
    %c0_29 = arith.constant 0 : index
    %18 = vector.load %arg1[%c0_26, %c1_27, %c0_28, %c0_29] : memref<1x36x9x4xbf16, #tpu.memory_space<vmem>>, vector<1x8x8x4xbf16>
    %19 = vector.shape_cast %18 : vector<1x8x8x4xbf16> to vector<64x4xbf16>
    %c0_30 = arith.constant 0 : index
    %c24 = arith.constant 24 : index
    %20 = vector.load %arg6[%c0_30, %c24] : memref<64x36xbf16, #tpu.memory_space<vmem>>, vector<64x4xbf16>
    tpu.vector_store %arg6[%c0_30, %c24], %19 {strides = array<i32>} : memref<64x36xbf16, #tpu.memory_space<vmem>>, vector<64x4xbf16>,
    %c0_31 = arith.constant 0 : index
    %c10 = arith.constant 10 : index
    %c0_32 = arith.constant 0 : index
    %c0_33 = arith.constant 0 : index
    %21 = vector.load %arg1[%c0_31, %c10, %c0_32, %c0_33] : memref<1x36x9x4xbf16, #tpu.memory_space<vmem>>, vector<1x8x8x4xbf16>
    %22 = vector.shape_cast %21 : vector<1x8x8x4xbf16> to vector<64x4xbf16>
    %c0_34 = arith.constant 0 : index
    %c28 = arith.constant 28 : index
    %23 = vector.load %arg6[%c0_34, %c28] : memref<64x36xbf16, #tpu.memory_space<vmem>>, vector<64x4xbf16>
    tpu.vector_store %arg6[%c0_34, %c28], %22 {strides = array<i32>} : memref<64x36xbf16, #tpu.memory_space<vmem>>, vector<64x4xbf16>,
    %c0_35 = arith.constant 0 : index
    %c1_36 = arith.constant 1 : index
    %c1_37 = arith.constant 1 : index
    %c0_38 = arith.constant 0 : index
    %24 = vector.load %arg1[%c0_35, %c1_36, %c1_37, %c0_38] : memref<1x36x9x4xbf16, #tpu.memory_space<vmem>>, vector<1x8x8x4xbf16>
    %25 = vector.shape_cast %24 : vector<1x8x8x4xbf16> to vector<64x4xbf16>
    %c0_39 = arith.constant 0 : index
    %c32 = arith.constant 32 : index
    %26 = vector.load %arg6[%c0_39, %c32] : memref<64x36xbf16, #tpu.memory_space<vmem>>, vector<64x4xbf16>
    tpu.vector_store %arg6[%c0_39, %c32], %25 {strides = array<i32>} : memref<64x36xbf16, #tpu.memory_space<vmem>>, vector<64x4xbf16>,
    %c0_40 = arith.constant 0 : index
    %c0_41 = arith.constant 0 : index
    %27 = vector.load %arg6[%c0_40, %c0_41] : memref<64x36xbf16, #tpu.memory_space<vmem>>, vector<64x36xbf16>
    %c0_42 = arith.constant 0 : index
    %c0_43 = arith.constant 0 : index
    %28 = vector.load %arg2[%c0_42, %c0_43] : memref<36x16xbf16, #tpu.memory_space<vmem>>, vector<36x16xbf16>
    %cst = arith.constant dense<0.000000e+00> : vector<64x16xf32>
    %29 = tpu.matmul %27, %28, %cst {dimension_numbers = #tpu.dot_dimension_numbers<[1], [0], [0], [1], [0, 0, 1, 1], [], []>} : vector<64x36xbf16>, vector<36x16xbf16>, vector<64x16xf32> -> vector<64x16xf32>
    %30 = vector.extract_strided_slice %29 {offsets = [0, 0], sizes = [64, 8], strides = [1, 1]} : vector<64x16xf32> to vector<64x8xf32>
    %c0_44 = arith.constant 0 : index
    %c0_45 = arith.constant 0 : index
    %31 = vector.load %arg4[%c0_44, %c0_45] : memref<3x8xf32, #tpu.memory_space<vmem>>, vector<1x8xf32>
    %32 = vector.broadcast %31 : vector<1x8xf32> to vector<64x8xf32>
    %33 = arith.addf %30, %32 : vector<64x8xf32>
    %cst_46 = arith.constant 0.000000e+00 : f32
    %34 = vector.broadcast %cst_46 : f32 to vector<64x8xf32>
    %35 = arith.maximumf %33, %34 : vector<64x8xf32>
    %36 = arith.truncf %35 : vector<64x8xf32> to vector<64x8xbf16>
    %37 = vector.shape_cast %36 : vector<64x8xbf16> to vector<1x8x8x8xbf16>
    %cst_47 = arith.constant 0.000000e+00 : bf16
    %38 = vector.broadcast %cst_47 : bf16 to vector<1x1x10x8xbf16>
    %c0_48 = arith.constant 0 : index
    %c0_49 = arith.constant 0 : index
    %c0_50 = arith.constant 0 : index
    %c0_51 = arith.constant 0 : index
    %39 = vector.load %arg7[%c0_48, %c0_49, %c0_50, %c0_51] : memref<1x10x10x8xbf16, #tpu.memory_space<vmem>>, vector<1x1x10x8xbf16>
    tpu.vector_store %arg7[%c0_48, %c0_49, %c0_50, %c0_51], %38 {strides = array<i32>} : memref<1x10x10x8xbf16, #tpu.memory_space<vmem>>, vector<1x1x10x8xbf16>,
    %cst_52 = arith.constant 0.000000e+00 : bf16
    %40 = vector.broadcast %cst_52 : bf16 to vector<1x1x10x8xbf16>
    %c0_53 = arith.constant 0 : index
    %c9_54 = arith.constant 9 : index
    %c0_55 = arith.constant 0 : index
    %c0_56 = arith.constant 0 : index
    %41 = vector.load %arg7[%c0_53, %c9_54, %c0_55, %c0_56] : memref<1x10x10x8xbf16, #tpu.memory_space<vmem>>, vector<1x1x10x8xbf16>
    tpu.vector_store %arg7[%c0_53, %c9_54, %c0_55, %c0_56], %40 {strides = array<i32>} : memref<1x10x10x8xbf16, #tpu.memory_space<vmem>>, vector<1x1x10x8xbf16>,
    %cst_57 = arith.constant 0.000000e+00 : bf16
    %42 = vector.broadcast %cst_57 : bf16 to vector<1x8x1x8xbf16>
    %c0_58 = arith.constant 0 : index
    %c1_59 = arith.constant 1 : index
    %c0_60 = arith.constant 0 : index
    %c0_61 = arith.constant 0 : index
    %43 = vector.load %arg7[%c0_58, %c1_59, %c0_60, %c0_61] : memref<1x10x10x8xbf16, #tpu.memory_space<vmem>>, vector<1x8x1x8xbf16>
    tpu.vector_store %arg7[%c0_58, %c1_59, %c0_60, %c0_61], %42 {strides = array<i32>} : memref<1x10x10x8xbf16, #tpu.memory_space<vmem>>, vector<1x8x1x8xbf16>,
    %cst_62 = arith.constant 0.000000e+00 : bf16
    %44 = vector.broadcast %cst_62 : bf16 to vector<1x8x1x8xbf16>
    %c0_63 = arith.constant 0 : index
    %c1_64 = arith.constant 1 : index
    %c9_65 = arith.constant 9 : index
    %c0_66 = arith.constant 0 : index
    %45 = vector.load %arg7[%c0_63, %c1_64, %c9_65, %c0_66] : memref<1x10x10x8xbf16, #tpu.memory_space<vmem>>, vector<1x8x1x8xbf16>
    tpu.vector_store %arg7[%c0_63, %c1_64, %c9_65, %c0_66], %44 {strides = array<i32>} : memref<1x10x10x8xbf16, #tpu.memory_space<vmem>>, vector<1x8x1x8xbf16>,
    %c0_67 = arith.constant 0 : index
    %c1_68 = arith.constant 1 : index
    %c1_69 = arith.constant 1 : index
    %c0_70 = arith.constant 0 : index
    %46 = vector.load %arg7[%c0_67, %c1_68, %c1_69, %c0_70] : memref<1x10x10x8xbf16, #tpu.memory_space<vmem>>, vector<1x8x8x8xbf16>
    tpu.vector_store %arg7[%c0_67, %c1_68, %c1_69, %c0_70], %37 {strides = array<i32>} : memref<1x10x10x8xbf16, #tpu.memory_space<vmem>>, vector<1x8x8x8xbf16>,
    %c0_71 = arith.constant 0 : index
    %c0_72 = arith.constant 0 : index
    %c0_73 = arith.constant 0 : index
    %c0_74 = arith.constant 0 : index
    %47 = vector.load %arg7[%c0_71, %c0_72, %c0_73, %c0_74] : memref<1x10x10x8xbf16, #tpu.memory_space<vmem>>, vector<1x8x8x8xbf16>
    %48 = vector.shape_cast %47 : vector<1x8x8x8xbf16> to vector<64x8xbf16>
    %c0_75 = arith.constant 0 : index
    %c0_76 = arith.constant 0 : index
    %49 = vector.load %arg8[%c0_75, %c0_76] : memref<64x72xbf16, #tpu.memory_space<vmem>>, vector<64x8xbf16>
    tpu.vector_store %arg8[%c0_75, %c0_76], %48 {strides = array<i32>} : memref<64x72xbf16, #tpu.memory_space<vmem>>, vector<64x8xbf16>,
    %c0_77 = arith.constant 0 : index
    %c0_78 = arith.constant 0 : index
    %c1_79 = arith.constant 1 : index
    %c0_80 = arith.constant 0 : index
    %50 = vector.load %arg7[%c0_77, %c0_78, %c1_79, %c0_80] : memref<1x10x10x8xbf16, #tpu.memory_space<vmem>>, vector<1x8x8x8xbf16>
    %51 = vector.shape_cast %50 : vector<1x8x8x8xbf16> to vector<64x8xbf16>
    %c0_81 = arith.constant 0 : index
    %c8_82 = arith.constant 8 : index
    %52 = vector.load %arg8[%c0_81, %c8_82] : memref<64x72xbf16, #tpu.memory_space<vmem>>, vector<64x8xbf16>
    tpu.vector_store %arg8[%c0_81, %c8_82], %51 {strides = array<i32>} : memref<64x72xbf16, #tpu.memory_space<vmem>>, vector<64x8xbf16>,
    %c0_83 = arith.constant 0 : index
    %c0_84 = arith.constant 0 : index
    %c2 = arith.constant 2 : index
    %c0_85 = arith.constant 0 : index
    %53 = vector.load %arg7[%c0_83, %c0_84, %c2, %c0_85] : memref<1x10x10x8xbf16, #tpu.memory_space<vmem>>, vector<1x8x8x8xbf16>
    %54 = vector.shape_cast %53 : vector<1x8x8x8xbf16> to vector<64x8xbf16>
    %c0_86 = arith.constant 0 : index
    %c16_87 = arith.constant 16 : index
    %55 = vector.load %arg8[%c0_86, %c16_87] : memref<64x72xbf16, #tpu.memory_space<vmem>>, vector<64x8xbf16>
    tpu.vector_store %arg8[%c0_86, %c16_87], %54 {strides = array<i32>} : memref<64x72xbf16, #tpu.memory_space<vmem>>, vector<64x8xbf16>,
    %c0_88 = arith.constant 0 : index
    %c1_89 = arith.constant 1 : index
    %c0_90 = arith.constant 0 : index
    %c0_91 = arith.constant 0 : index
    %56 = vector.load %arg7[%c0_88, %c1_89, %c0_90, %c0_91] : memref<1x10x10x8xbf16, #tpu.memory_space<vmem>>, vector<1x8x8x8xbf16>
    %57 = vector.shape_cast %56 : vector<1x8x8x8xbf16> to vector<64x8xbf16>
    %c0_92 = arith.constant 0 : index
    %c24_93 = arith.constant 24 : index
    %58 = vector.load %arg8[%c0_92, %c24_93] : memref<64x72xbf16, #tpu.memory_space<vmem>>, vector<64x8xbf16>
    tpu.vector_store %arg8[%c0_92, %c24_93], %57 {strides = array<i32>} : memref<64x72xbf16, #tpu.memory_space<vmem>>, vector<64x8xbf16>,
    %c0_94 = arith.constant 0 : index
    %c1_95 = arith.constant 1 : index
    %c1_96 = arith.constant 1 : index
    %c0_97 = arith.constant 0 : index
    %59 = vector.load %arg7[%c0_94, %c1_95, %c1_96, %c0_97] : memref<1x10x10x8xbf16, #tpu.memory_space<vmem>>, vector<1x8x8x8xbf16>
    %60 = vector.shape_cast %59 : vector<1x8x8x8xbf16> to vector<64x8xbf16>
    %c0_98 = arith.constant 0 : index
    %c32_99 = arith.constant 32 : index
    %61 = vector.load %arg8[%c0_98, %c32_99] : memref<64x72xbf16, #tpu.memory_space<vmem>>, vector<64x8xbf16>
    tpu.vector_store %arg8[%c0_98, %c32_99], %60 {strides = array<i32>} : memref<64x72xbf16, #tpu.memory_space<vmem>>, vector<64x8xbf16>,
    %c0_100 = arith.constant 0 : index
    %c1_101 = arith.constant 1 : index
    %c2_102 = arith.constant 2 : index
    %c0_103 = arith.constant 0 : index
    %62 = vector.load %arg7[%c0_100, %c1_101, %c2_102, %c0_103] : memref<1x10x10x8xbf16, #tpu.memory_space<vmem>>, vector<1x8x8x8xbf16>
    %63 = vector.shape_cast %62 : vector<1x8x8x8xbf16> to vector<64x8xbf16>
    %c0_104 = arith.constant 0 : index
    %c40 = arith.constant 40 : index
    %64 = vector.load %arg8[%c0_104, %c40] : memref<64x72xbf16, #tpu.memory_space<vmem>>, vector<64x8xbf16>
    tpu.vector_store %arg8[%c0_104, %c40], %63 {strides = array<i32>} : memref<64x72xbf16, #tpu.memory_space<vmem>>, vector<64x8xbf16>,
    %c0_105 = arith.constant 0 : index
    %c2_106 = arith.constant 2 : index
    %c0_107 = arith.constant 0 : index
    %c0_108 = arith.constant 0 : index
    %65 = vector.load %arg7[%c0_105, %c2_106, %c0_107, %c0_108] : memref<1x10x10x8xbf16, #tpu.memory_space<vmem>>, vector<1x8x8x8xbf16>
    %66 = vector.shape_cast %65 : vector<1x8x8x8xbf16> to vector<64x8xbf16>
    %c0_109 = arith.constant 0 : index
    %c48 = arith.constant 48 : index
    %67 = vector.load %arg8[%c0_109, %c48] : memref<64x72xbf16, #tpu.memory_space<vmem>>, vector<64x8xbf16>
    tpu.vector_store %arg8[%c0_109, %c48], %66 {strides = array<i32>} : memref<64x72xbf16, #tpu.memory_space<vmem>>, vector<64x8xbf16>,
    %c0_110 = arith.constant 0 : index
    %c2_111 = arith.constant 2 : index
    %c1_112 = arith.constant 1 : index
    %c0_113 = arith.constant 0 : index
    %68 = vector.load %arg7[%c0_110, %c2_111, %c1_112, %c0_113] : memref<1x10x10x8xbf16, #tpu.memory_space<vmem>>, vector<1x8x8x8xbf16>
    %69 = vector.shape_cast %68 : vector<1x8x8x8xbf16> to vector<64x8xbf16>
    %c0_114 = arith.constant 0 : index
    %c56 = arith.constant 56 : index
    %70 = vector.load %arg8[%c0_114, %c56] : memref<64x72xbf16, #tpu.memory_space<vmem>>, vector<64x8xbf16>
    tpu.vector_store %arg8[%c0_114, %c56], %69 {strides = array<i32>} : memref<64x72xbf16, #tpu.memory_space<vmem>>, vector<64x8xbf16>,
    %c0_115 = arith.constant 0 : index
    %c2_116 = arith.constant 2 : index
    %c2_117 = arith.constant 2 : index
    %c0_118 = arith.constant 0 : index
    %71 = vector.load %arg7[%c0_115, %c2_116, %c2_117, %c0_118] : memref<1x10x10x8xbf16, #tpu.memory_space<vmem>>, vector<1x8x8x8xbf16>
    %72 = vector.shape_cast %71 : vector<1x8x8x8xbf16> to vector<64x8xbf16>
    %c0_119 = arith.constant 0 : index
    %c64 = arith.constant 64 : index
    %73 = vector.load %arg8[%c0_119, %c64] : memref<64x72xbf16, #tpu.memory_space<vmem>>, vector<64x8xbf16>
    tpu.vector_store %arg8[%c0_119, %c64], %72 {strides = array<i32>} : memref<64x72xbf16, #tpu.memory_space<vmem>>, vector<64x8xbf16>,
    %c0_120 = arith.constant 0 : index
    %c0_121 = arith.constant 0 : index
    %74 = vector.load %arg8[%c0_120, %c0_121] : memref<64x72xbf16, #tpu.memory_space<vmem>>, vector<64x72xbf16>
    %c0_122 = arith.constant 0 : index
    %c0_123 = arith.constant 0 : index
    %75 = vector.load %arg3[%c0_122, %c0_123] : memref<72x8xbf16, #tpu.memory_space<vmem>>, vector<72x8xbf16>
    %cst_124 = arith.constant dense<0.000000e+00> : vector<64x8xf32>
    %76 = tpu.matmul %74, %75, %cst_124 {dimension_numbers = #tpu.dot_dimension_numbers<[1], [0], [0], [1], [0, 0, 1, 1], [], []>} : vector<64x72xbf16>, vector<72x8xbf16>, vector<64x8xf32> -> vector<64x8xf32>
    %c1_125 = arith.constant 1 : index
    %c0_126 = arith.constant 0 : index
    %77 = vector.load %arg4[%c1_125, %c0_126] : memref<3x8xf32, #tpu.memory_space<vmem>>, vector<1x8xf32>
    %78 = vector.broadcast %77 : vector<1x8xf32> to vector<64x8xf32>
    %79 = arith.addf %76, %78 : vector<64x8xf32>
    %80 = vector.extract_strided_slice %29 {offsets = [0, 8], sizes = [64, 8], strides = [1, 1]} : vector<64x16xf32> to vector<64x8xf32>
    %c2_127 = arith.constant 2 : index
    %c0_128 = arith.constant 0 : index
    %81 = vector.load %arg4[%c2_127, %c0_128] : memref<3x8xf32, #tpu.memory_space<vmem>>, vector<1x8xf32>
    %82 = vector.broadcast %81 : vector<1x8xf32> to vector<64x8xf32>
    %83 = arith.addf %80, %82 : vector<64x8xf32>
    %84 = arith.addf %79, %83 : vector<64x8xf32>
    %cst_129 = arith.constant 0.000000e+00 : f32
    %85 = vector.broadcast %cst_129 : f32 to vector<64x8xf32>
    %86 = arith.maximumf %84, %85 : vector<64x8xf32>
    %87 = vector.shape_cast %86 : vector<64x8xf32> to vector<1x8x8x8xf32>
    %c0_130 = arith.constant 0 : index
    %c0_131 = arith.constant 0 : index
    %c0_132 = arith.constant 0 : index
    %c0_133 = arith.constant 0 : index
    %88 = vector.load %arg5[%c0_130, %c0_131, %c0_132, %c0_133] : memref<1x8x8x8xf32, #tpu.memory_space<vmem>>, vector<1x8x8x8xf32>
    tpu.vector_store %arg5[%c0_130, %c0_131, %c0_132, %c0_133], %87 {strides = array<i32>} : memref<1x8x8x8xf32, #tpu.memory_space<vmem>>, vector<1x8x8x8xf32>,
    return
  }
  func.func @transform_0(%arg0: i32) -> (i32, i32, i32, i32) {
    %c0_i32 = arith.constant 0 : i32
    %c0_i32_0 = arith.constant 0 : i32
    %c0_i32_1 = arith.constant 0 : i32
    %c0_i32_2 = arith.constant 0 : i32
    return %arg0, %c0_i32, %c0_i32_0, %c0_i32_1 : i32, i32, i32, i32
  }
  func.func @transform_1(%arg0: i32) -> (i32, i32) {
    %c0_i32 = arith.constant 0 : i32
    %c0_i32_0 = arith.constant 0 : i32
    %c0_i32_1 = arith.constant 0 : i32
    return %c0_i32, %c0_i32_0 : i32, i32
  }
  func.func @transform_2(%arg0: i32) -> (i32, i32) {
    %c0_i32 = arith.constant 0 : i32
    %c0_i32_0 = arith.constant 0 : i32
    %c0_i32_1 = arith.constant 0 : i32
    return %c0_i32, %c0_i32_0 : i32, i32
  }
  func.func @transform_3(%arg0: i32) -> (i32, i32) {
    %c0_i32 = arith.constant 0 : i32
    %c0_i32_0 = arith.constant 0 : i32
    %c0_i32_1 = arith.constant 0 : i32
    return %c0_i32, %c0_i32_0 : i32, i32
  }
  func.func @transform_4(%arg0: i32) -> (i32, i32, i32, i32) {
    %c0_i32 = arith.constant 0 : i32
    %c0_i32_0 = arith.constant 0 : i32
    %c0_i32_1 = arith.constant 0 : i32
    %c0_i32_2 = arith.constant 0 : i32
    return %arg0, %c0_i32, %c0_i32_0, %c0_i32_1 : i32, i32, i32, i32
  }
}

</mosaic_0001>

<bundles_post_ra>
// kernel: tpu_custom_call.1
= control target key start
LH: loop header
LB: loop body
LE: loop exit
PB: predicated region body
PF: predicated region fallthrough
CT: control target
= control target key end

     0   :  { %9 = vsyncpa [#allocation6], 0  ;;  %s3608_s0 = inlined_call_operand.vmem [shape: bf16[2,36,9,4], index: 0, kind: input, shape index: {}]   ;;  %s3609_s1 = inlined_call_operand.vmem [shape: bf16[36,16], index: 1, kind: input, shape index: {}]   ;;  %s3610_s2 = inlined_call_operand.vmem [shape: bf16[72,8], index: 2, kind: input, shape index: {}]   ;;  %s3611_s3 = inlined_call_operand.vmem [shape: f32[3,8], index: 3, kind: input, shape index: {}]   ;;  %s3612_s4 = inlined_call_operand.hbm [shape: f32[2,8,8,8], index: 4, kind: output, shape index: {}]  }
   0x1   :  { %11 = vsyncpa [#allocation6 + $0x1], 0  ;;  %s2906_s15 = smov 0   ;;  %s2908_s16 = smov 0  }
   0x2   :  { %s2910_s17 = smov 0   ;;  %s2912_s18 = smov 0  }
   0x3 LB: > { %s2927_s19 = sadd.s32 4294967295, %s2863_s18   ;;  %s2437_s20 = sadd.s32 4294967294, %s2863_s18   ;;  %s2863_s18 = sphi %s2912_s18, %s3628_s18   ;;  %s2859_s17 = sphi %s2910_s17, %s3627_s17   ;;  %s2855_s16 = sphi %s2908_s16, %s3626_s16   ;;  %s2851_s15 = sphi %s2906_s15, %s3625_s15  }
   0x4   : > { %s2931_s21 = sadd.s32 1, %s2863_s18   ;;  %s113_s22 = sadd.s32 1, %s2859_s17 }
   0x5   : > { %s110_s23 = ssub.s32 %s2863_s18, %s2931_s21  ;;  %p123_p0 = scmp.ne.s32.totalorder %s2859_s17, %s2855_s16 }
   0x6   : > { %p111_p1 = scmp.eq.s32.totalorder %s110_s23, 0  ;;  %p124_p2 = scmp.eq.s32.totalorder %s2927_s19, 1 }
   0x7   : > { %p129_p3 = scmp.ne.s32.totalorder %s2855_s16, %s2851_s15  ;;  %p130_p4 = scmp.eq.s32.totalorder %s2437_s20, 1 }
   0x8   : > { %s2942_s24 = scalar_select %p111_p1, %s2859_s17, %s113_s22  }
   0x9   : > { %p2944_p5 = por %p124_p2, %p123_p0  ;;  %p2948_p6 = por %p130_p4, %p129_p3 }
   0xa   : > { %p2440_p7 = scmp.ge.s32.totalorder %s2863_s18, 1  ;;  %p165_p8 = scmp.lt.s32.totalorder %s2863_s18, 3 }
   0xc   : > { %p166_p9 = pnand %p2440_p7, %p165_p8 }
   0xd   : > { %p191_p10 = scmp.lt.s32.totalorder (!%p166_p9), %s2927_s19, 1  ;;  %vm296_vm0 = vsmask.f32 (!%p166_p9), 3328  ;;  %vm297_vm1 = vsmask.f32 (!%p166_p9), 7440  ;;  %s2865_s6 = smov (!%p166_p9), 4  }
   0xe   : > { %169 = sbr.rel (%p166_p9) target bundleno = 882 (0x372), region = 36  ;;  %s2866_s7 = smov (!%p166_p9), 12   ;;  %vm2982_vm2 = vmor (!%p166_p9), %vm296_vm0, %vm297_vm1  ;;  %vm229_vm3 = vcmask (!%p166_p9), 31744   ;;  %vm975_vm4 = vcmask (!%p166_p9), 1041408   ;;  %vm275_vm5 = vcmask (!%p166_p9), 64544   ;;  %vm435_vm6 = vcmask (!%p166_p9), 97344  }
   0xf   : > { %s2867_s8 = smov (!%p166_p9), 16   ;;  %s2868_s9 = smov (!%p166_p9), 8   ;;  %vm481_vm7 = vcmask (!%p166_p9), 130144   ;;  %vm527_vm8 = vcmask (!%p166_p9), 162944   ;;  %vm684_vm9 = vcmask (!%p166_p9), 195744   ;;  %vm730_vm10 = vcmask (!%p166_p9), 228544  }
  0x10   : > { %s2869_s10 = smov (!%p166_p9), 20   ;;  %s2870_s13 = smov (!%p166_p9), 24   ;;  %vm776_vm11 = vcmask (!%p166_p9), 261344   ;;  %vm933_vm12 = vcmask (!%p166_p9), 294144   ;;  %vm962_vm13 = vcmask (!%p166_p9), 293888   ;;  %vm1089_vm14 = vcmask (!%p166_p9), 60416  }
  0x11   : > { %s2871_s22 = smov (!%p166_p9), 28   ;;  %s2872_s23 = smov (!%p166_p9), 32   ;;  %vm1091_vm15 = vcmask (!%p166_p9), 57344   ;;  %vm1098_vm0 = vsmask.f32 (!%p166_p9), 256 }
  0x12   : > { %vm3170_vm1 = vmand (!%p166_p9), %vm1091_vm15, %vm1098_vm0  ;;  %vm2063_vm0 = vcmask (!%p166_p9), 523712  }
  0x15   : > { %s192_s27 = scalar_select %p191_p10, %s2927_s19, 1 }
  0x17   : > { %s2702_s28 = smul.u32 288, %s192_s27 }
  0x19   : > { %s2959_s5 = scalar_lea.vmem %s3608_s0, %s2702_s28 }
  0x1a   : > { %v2757_v0 = vld [vmem:[%s2959_s5 + $0x48] ss:$8 sps:$4 sm:$0xff]   ;;  %v2759_v2 = vld [vmem:[%s2959_s5 + $0x58] ss:$8 sps:$4 sm:$0xff]   ;;  %v281_v6 = vld [vmem:[%s2959_s5 + $0x4] sm:$0x1] }
  0x1b   : > { %v2758_v1 = vld [vmem:[%s2959_s5 + $0xa0] ss:$8 sps:$4 sm:$0xff]   ;;  %263 = vrot.lane.b32.xlu0 %v2757_v0, %s2865_s6  ;;  %v2761_v4 = vld [vmem:[%s2959_s5 + $0x90] ss:$8 sps:$4 sm:$0xff]   ;;  %v283_v8 = vld [vmem:[%s2959_s5 + $0xc] sm:$0x1] }
  0x1c   : > { %471 = vrot.lane.b32.xlu1 %v2758_v1, %s2866_s7  ;;  %v2760_v3 = vld [vmem:[%s2959_s5 + $0xe8] ss:$8 sps:$4 sm:$0xff]   ;;  %v280_v5 = vld [vmem:[%s2959_s5] sm:$0xf]  ;;  %v309_v11 = vshll.u32 %v281_v6, 16  ;;  %v323_v14 = vshll.u32 %v283_v8, 16 }
  0x1d   : > { %v282_v7 = vld [vmem:[%s2959_s5 + $0x8] sm:$0xf]  ;;  %v300_v9 = vshrl.u32 %v280_v5, 16  ;;  %v303_v10 = vshll.u32 %v280_v5, 16  ;;  %v2762_v19 = vld [vmem:[%s2959_s5 + $0xd8] ss:$8 sps:$4 sm:$0xff]  }
  0x1e   : > { %v314_v12 = vshrl.u32 %v282_v7, 16  ;;  %v317_v13 = vshll.u32 %v282_v7, 16  ;;  %v311_v17 = vrot.slane %v309_v11, 5  ;;  %v325_v21 = vrot.slane %v323_v14, 5  ;;  %v284_v22 = vld [vmem:[%s2959_s5 + $0x10] sm:$0xf] }
  0x1f   : > { %265 = vrot.lane.b32.xlu0 %v2759_v2, %s2865_s6  ;;  %v302_v15 = vrot.slane %v300_v9, 4  ;;  %v305_v16 = vrot.slane %v303_v10, 5  ;;  %v285_v23 = vld [vmem:[%s2959_s5 + $0x14] sm:$0x1]  ;;  %v286_v25 = vld [vmem:[%s2959_s5 + $0x18] sm:$0xf] }
  0x20   : > { %517 = vrot.lane.b32.xlu1 %v2760_v3, %s2867_s8  ;;  %v316_v18 = vrot.slane %v314_v12, 4  ;;  %v319_v20 = vrot.slane %v317_v13, 5  ;;  %v287_v26 = vld [vmem:[%s2959_s5 + $0x1c] sm:$0x1]  ;;  %v328_v27 = vshrl.u32 %v284_v22, 16  ;;  %v331_v28 = vshll.u32 %v284_v22, 16 }
  0x21   : > { %v306_v24 = vor.u32 %v305_v16, %v302_v15  ;;  %v337_v31 = vshll.u32 %v285_v23, 16  ;;  %v342_v32 = vshrl.u32 %v286_v25, 16  ;;  %v345_v33 = vshll.u32 %v286_v25, 16  ;;  %v2487_v34 = vld [vmem:[%s2959_s5 + $0x90] sm:$0xf] }
  0x22   : > { %v320_v30 = vor.u32 %v319_v20, %v316_v18  ;;  %v330_v36 = vrot.slane %v328_v27, 4  ;;  %v333_v37 = vrot.slane %v331_v28, 5  ;;  %v351_v38 = vshll.u32 %v287_v26, 16  ;;  %v2488_v39 = vld [vmem:[%s2959_s5 + $0x94] sm:$0x1] }
  0x23   : > { %469 = vrot.lane.b32.xlu0 %v2761_v4, %s2866_s7  ;;  %v307_v35 = vrot.slane %v306_v24, 4  ;;  %v339_v41 = vrot.slane %v337_v31, 5  ;;  %v344_v42 = vrot.slane %v342_v32, 4  ;;  %v347_v43 = vrot.slane %v345_v33, 5  ;;  %v2489_v44 = vld [vmem:[%s2959_s5 + $0x98] sm:$0xf] }
  0x24   : > { %v321_v40 = vrot.slane %v320_v30, 4  ;;  %v334_v46 = vor.u32 %v333_v37, %v330_v36  ;;  %v353_v47 = vrot.slane %v351_v38, 5  ;;  %v2490_v48 = vld [vmem:[%s2959_s5 + $0x9c] sm:$0x1]  ;;  %v549_v49 = vshrl.u32 %v2487_v34, 16 }
  0x25   : > { %v312_v45 = vsel %vm2982_vm2, %v307_v35, %v311_v17  ;;  %v348_v51 = vor.u32 %v347_v43, %v344_v42  ;;  %v552_v52 = vshll.u32 %v2487_v34, 16  ;;  %v558_v53 = vshll.u32 %v2488_v39, 16  ;;  %v2491_v54 = vld [vmem:[%s2959_s5 + $0xa0] sm:$0xf]  ;;  %v2492_v55 = vld [vmem:[%s2959_s5 + $0xa4] sm:$0x1] }
  0x26   : > { %v326_v50 = vsel %vm2982_vm2, %v321_v40, %v325_v21  ;;  %v335_v57 = vrot.slane %v334_v46, 4  ;;  %v551_v58 = vrot.slane %v549_v49, 4  ;;  %v563_v59 = vshrl.u32 %v2489_v44, 16  ;;  %v2493_v60 = vld [vmem:[%s2959_s5 + $0xa8] sm:$0xf] }
  0x27   : > { %515 = vrot.lane.b32.xlu0 %v2762_v19, %s2867_s8  ;;  %v2459_v56 = vcombine.low %v312_v45, %v326_v50  ;;  %v349_v61 = vrot.slane %v348_v51, 4  ;;  %v554_v62 = vrot.slane %v552_v52, 5  ;;  %v560_v63 = vrot.slane %v558_v53, 5  ;;  %v2494_v8 = vld [vmem:[%s2959_s5 + $0xac] sm:$0x1] }
  0x28   : > { %v566_v0 = vshll.u32 %v2489_v44, 16  ;;  %v340_v1 = vsel %vm2982_vm2, %v335_v57, %v339_v41  ;;  %v565_v2 = vrot.slane %v563_v59, 4  ;;  %v572_v3 = vshll.u32 %v2490_v48, 16  ;;  %v2531_v30 = vld [vmem:[%s2959_s5 + $0x8] sm:$0xf] }
  0x29   : > { %423 = vrot.lane.b32.xlu1 %v2459_v56, %s2868_s9  ;;  %v577_v4 = vshrl.u32 %v2491_v54, 16  ;;  %v354_v5 = vsel %vm2982_vm2, %v349_v61, %v353_v47  ;;  %v555_v6 = vor.u32 %v554_v62, %v551_v58  ;;  %v580_v9 = vshll.u32 %v2491_v54, 16  ;;  %v2763_v33 = vld [vmem:[%s2959_s5 + $0x8] ss:$8 sps:$4 sm:$0xff]   ;;  %v2532_v34 = vld [vmem:[%s2959_s5 + $0xc] sm:$0x1] }
  0x2a   : > { %v568_v7 = vrot.slane %v566_v0, 5  ;;  %v2460_v10 = vcombine.low %v340_v1, %v354_v5  ;;  %v574_v11 = vrot.slane %v572_v3, 5  ;;  %v586_v13 = vshll.u32 %v2492_v55, 16  ;;  %v2533_v35 = vld [vmem:[%s2959_s5 + $0x10] sm:$0xf]  ;;  %v2779_v54 = vld [vmem:[%s3609_s1] sm:$0xff]  }
  0x2b   : > { %v579_v12 = vrot.slane %v577_v4, 4  ;;  %v556_v14 = vrot.slane %v555_v6, 4  ;;  %v582_v16 = vrot.slane %v580_v9, 5  ;;  %v591_v17 = vshrl.u32 %v2493_v60, 16  ;;  %v2534_v36 = vld [vmem:[%s2959_s5 + $0x14] sm:$0x1]  ;;  %2668 = vmatprep.subr.bf16.mxu0 %v2779_v54 }
  0x2c   : > { %v569_v15 = vor.u32 %v568_v7, %v565_v2  ;;  %v588_v18 = vrot.slane %v586_v13, 5  ;;  %v594_v19 = vshll.u32 %v2493_v60, 16  ;;  %v600_v20 = vshll.u32 %v2494_v8, 16  ;;  %v2765_v49 = vld [vmem:[%s2959_s5 + $0x50] ss:$8 sps:$4 sm:$0xff]   ;;  %v2781_v1 = vld [vmem:[%s3609_s1 + $0x8] sm:$0xff]   ;;  %2669 = vmatpush3.bf16.msra.mxu0 %v2779_v54 }
  0x2d   : > { %425 = vrot.lane.b32.xlu1 %v2460_v10, %s2868_s9  ;;  %v561_v21 = vsel %vm2982_vm2, %v556_v14, %v560_v63  ;;  %v583_v23 = vor.u32 %v582_v16, %v579_v12  ;;  %v593_v24 = vrot.slane %v591_v17, 4  ;;  %v798_v38 = vshrl.u32 %v2531_v30, 16  ;;  %v2535_v53 = vld [vmem:[%s2959_s5 + $0x18] sm:$0xf]  ;;  %v2536_v58 = vld [vmem:[%s2959_s5 + $0x1c] sm:$0x1]  ;;  %2670 = vmatprep.subr.bf16.mxu0 %v2781_v1 }
  0x2e   : > { %v570_v22 = vrot.slane %v569_v15, 4  ;;  %v596_v25 = vrot.slane %v594_v19, 5  ;;  %v602_v28 = vrot.slane %v600_v20, 5  ;;  %v801_v39 = vshll.u32 %v2531_v30, 16  ;;  %v2764_v56 = vld [vmem:[%s2959_s5 + $0x18] ss:$8 sps:$4 sm:$0xff]  }
  0x2f   : > { %v584_v27 = vrot.slane %v583_v23, 4  ;;  %v807_v40 = vshll.u32 %v2532_v34, 16  ;;  %v812_v42 = vshrl.u32 %v2533_v35, 16  ;;  %v815_v43 = vshll.u32 %v2533_v35, 16  ;;  %v2537_v59 = vld [vmem:[%s2959_s5 + $0x20] sm:$0xf] }
  0x30   : > { %v575_v26 = vsel %vm2982_vm2, %v570_v22, %v574_v11  ;;  %v597_v32 = vor.u32 %v596_v25, %v593_v24  ;;  %v821_v44 = vshll.u32 %v2534_v36, 16  ;;  %v800_v45 = vrot.slane %v798_v38, 4  ;;  %v2538_v60 = vld [vmem:[%s2959_s5 + $0x24] sm:$0x1]  ;;  %v288_v14 = vld [vmem:[%s2959_s5 + $0x20] sm:$0xf]  ;;  %2671 = vmatpush3.bf16.msra.mxu0 %v2781_v1 }
  0x31   : > { %v2503_v31 = vcombine.low %v561_v21, %v575_v26  ;;  %v589_v37 = vsel %vm2982_vm2, %v584_v27, %v588_v18  ;;  %v803_v46 = vrot.slane %v801_v39, 5  ;;  %v809_v47 = vrot.slane %v807_v40, 5  ;;  %v289_v17 = vld [vmem:[%s2959_s5 + $0x24] sm:$0x1]  ;;  %v290_v18 = vld [vmem:[%s2959_s5 + $0x28] sm:$0xf] }
  0x32   : > { %v598_v41 = vrot.slane %v597_v32, 4  ;;  %v814_v50 = vrot.slane %v812_v42, 4  ;;  %v817_v51 = vrot.slane %v815_v43, 5  ;;  %v823_v52 = vrot.slane %v821_v44, 5  ;;  %v291_v19 = vld [vmem:[%s2959_s5 + $0x2c] sm:$0x1] }
  0x33   : > { %672 = vrot.lane.b32.xlu0 %v2503_v31, %s2869_s10  ;;  %v804_v57 = vor.u32 %v803_v46, %v800_v45  ;;  %v826_v62 = vshrl.u32 %v2535_v53, 16  ;;  %v829_v63 = vshll.u32 %v2535_v53, 16  ;;  %v835_v0 = vshll.u32 %v2536_v58, 16  ;;  %v2766_v20 = vld [vmem:[%s2959_s5 + $0x60] ss:$8 sps:$4 sm:$0xff]  }
  0x34   : > { %v603_v48 = vsel %vm2982_vm2, %v598_v41, %v602_v28  ;;  %v818_v61 = vor.u32 %v817_v51, %v814_v50  ;;  %v840_v3 = vshrl.u32 %v2537_v59, 16  ;;  %v843_v4 = vshll.u32 %v2537_v59, 16  ;;  %v292_v25 = vld [vmem:[%s2959_s5 + $0x30] sm:$0xf]  ;;  %v293_v31 = vld [vmem:[%s2959_s5 + $0x34] sm:$0x1] }
  0x35   : > { %v2504_v55 = vcombine.low %v589_v37, %v603_v48  ;;  %v805_v2 = vrot.slane %v804_v57, 4  ;;  %v849_v5 = vshll.u32 %v2538_v60, 16  ;;  %v828_v7 = vrot.slane %v826_v62, 4  ;;  %v2767_v32 = vld [vmem:[%s2959_s5 + $0x68] ss:$8 sps:$4 sm:$0xff]  }
  0x36   : > { %v819_v6 = vrot.slane %v818_v61, 4  ;;  %v831_v8 = vrot.slane %v829_v63, 5  ;;  %v837_v9 = vrot.slane %v835_v0, 5  ;;  %v842_v11 = vrot.slane %v840_v3, 4  ;;  %v294_v37 = vld [vmem:[%s2959_s5 + $0x38] sm:$0xf] }
  0x37   : > { %718 = vrot.lane.b32.xlu0 %v2763_v33, %s2870_s13  ;;  %674 = vrot.lane.b32.xlu1 %v2504_v55, %s2869_s10  ;;  %v810_v10 = vsel %vm2982_vm2, %v805_v2, %v809_v47  ;;  %v845_v12 = vrot.slane %v843_v4, 5  ;;  %v851_v13 = vrot.slane %v849_v5, 5  ;;  %v356_v23 = vshrl.u32 %v288_v14, 16  ;;  %v295_v45 = vld [vmem:[%s2959_s5 + $0x3c] sm:$0x1] }
  0x38   : > { %v824_v15 = vsel %vm2982_vm2, %v819_v6, %v823_v52  ;;  %v832_v16 = vor.u32 %v831_v8, %v828_v7  ;;  %v359_v24 = vshll.u32 %v288_v14, 16  ;;  %v365_v27 = vshll.u32 %v289_v17, 16  ;;  %v2768_v58 = vld [vmem:[%s2959_s5 + $0x78] ss:$8 sps:$4 sm:$0xff]   ;;  %v2495_v5 = vld [vmem:[%s2959_s5 + $0xb0] sm:$0xf] }
  0x39   : > { %v2547_v21 = vcombine.low %v810_v10, %v824_v15  ;;  %v846_v22 = vor.u32 %v845_v12, %v842_v11  ;;  %v370_v28 = vshrl.u32 %v290_v18, 16  ;;  %v373_v30 = vshll.u32 %v290_v18, 16  ;;  %v2769_v4 = vld [vmem:[%s2959_s5 + $0xb0] ss:$8 sps:$4 sm:$0xff]   ;;  %v2496_v6 = vld [vmem:[%s2959_s5 + $0xb4] sm:$0x1] }
  0x3a   : > { %v833_v26 = vrot.slane %v832_v16, 4  ;;  %v358_v34 = vrot.slane %v356_v23, 4  ;;  %v361_v35 = vrot.slane %v359_v24, 5  ;;  %v379_v36 = vshll.u32 %v291_v19, 16  ;;  %v2497_v8 = vld [vmem:[%s2959_s5 + $0xb8] sm:$0xf] }
  0x3b   : > { %764 = vrot.lane.b32.xlu0 %v2765_v49, %s2871_s22  ;;  %720 = vrot.lane.b32.xlu1 %v2764_v56, %s2870_s13  ;;  %v847_v33 = vrot.slane %v846_v22, 4  ;;  %v367_v39 = vrot.slane %v365_v27, 5  ;;  %v372_v40 = vrot.slane %v370_v28, 4  ;;  %v375_v41 = vrot.slane %v373_v30, 5  ;;  %v2499_v15 = vld [vmem:[%s2959_s5 + $0xc0] sm:$0xf] }
  0x3c   : > { %v838_v38 = vsel %vm2982_vm2, %v833_v26, %v837_v9  ;;  %v362_v43 = vor.u32 %v361_v35, %v358_v34  ;;  %v381_v44 = vrot.slane %v379_v36, 5  ;;  %v384_v46 = vshrl.u32 %v292_v25, 16  ;;  %v2498_v9 = vld [vmem:[%s2959_s5 + $0xbc] sm:$0x1]  ;;  %v2771_v22 = vld [vmem:[%s2959_s5 + $0xf8] ss:$8 sps:$4 sm:$0xff]  }
  0x3d   : > { %v852_v42 = vsel %vm2982_vm2, %v847_v33, %v851_v13  ;;  %v376_v48 = vor.u32 %v375_v41, %v372_v40  ;;  %v387_v49 = vshll.u32 %v292_v25, 16  ;;  %v393_v50 = vshll.u32 %v293_v31, 16  ;;  %v2501_v26 = vld [vmem:[%s2959_s5 + $0xc8] sm:$0xf] }
  0x3e   : > { %v2548_v47 = vcombine.low %v838_v38, %v852_v42  ;;  %v363_v51 = vrot.slane %v362_v43, 4  ;;  %v386_v52 = vrot.slane %v384_v46, 4  ;;  %v398_v53 = vshrl.u32 %v294_v37, 16  ;;  %v2770_v28 = vld [vmem:[%s2959_s5 + $0xc0] ss:$8 sps:$4 sm:$0xff]  }
  0x3f   : > { %921 = vrot.lane.b32.xlu0 %v2547_v21, %s2872_s23  ;;  %766 = vrot.lane.b32.xlu1 %v2766_v20, %s2871_s22  ;;  %v401_v54 = vshll.u32 %v294_v37, 16  ;;  %v377_v55 = vrot.slane %v376_v48, 4  ;;  %v389_v56 = vrot.slane %v387_v49, 5  ;;  %v407_v57 = vshll.u32 %v295_v45, 16  ;;  %v2500_v20 = vld [vmem:[%s2959_s5 + $0xc4] sm:$0x1] }
  0x40   : > { %v368_v59 = vsel %vm2982_vm2, %v363_v51, %v367_v39  ;;  %v400_v60 = vrot.slane %v398_v53, 4  ;;  %v395_v0 = vrot.slane %v393_v50, 5  ;;  %v605_v10 = vshrl.u32 %v2495_v5, 16  ;;  %v2772_v45 = vld [vmem:[%s2959_s5 + $0x108] ss:$8 sps:$4 sm:$0xff]  }
  0x41   : > { %v403_v61 = vrot.slane %v401_v54, 5  ;;  %v382_v62 = vsel %vm2982_vm2, %v377_v55, %v381_v44  ;;  %v390_v63 = vor.u32 %v389_v56, %v386_v52  ;;  %v409_v3 = vrot.slane %v407_v57, 5  ;;  %v2773_v56 = vld [vmem:[%s2959_s5 + $0x28] ss:$8 sps:$4 sm:$0xff]  }
  0x42   : > { %v2461_v1 = vcombine.low %v368_v59, %v382_v62  ;;  %v608_v12 = vshll.u32 %v2495_v5, 16  ;;  %v614_v13 = vshll.u32 %v2496_v6, 16  ;;  %v619_v14 = vshrl.u32 %v2497_v8, 16  ;;  %v2540_v59 = vld [vmem:[%s2959_s5 + $0x2c] sm:$0x1] }
  0x43   : > { %923 = vrot.lane.b32.xlu0 %v2548_v47, %s2872_s23  ;;  %267 = vrot.lane.b32.xlu1 %v2767_v32, %s2865_s6  ;;  %v404_v2 = vor.u32 %v403_v61, %v400_v60  ;;  %v391_v7 = vrot.slane %v390_v63, 4  ;;  %v607_v17 = vrot.slane %v605_v10, 4  ;;  %v622_v18 = vshll.u32 %v2497_v8, 16  ;;  %v2502_v32 = vld [vmem:[%s2959_s5 + $0xcc] sm:$0x1] }
  0x44   : > { %v628_v19 = vshll.u32 %v2498_v9, 16  ;;  %v610_v23 = vrot.slane %v608_v12, 5  ;;  %v616_v24 = vrot.slane %v614_v13, 5  ;;  %v621_v25 = vrot.slane %v619_v14, 4  ;;  %v2541_v61 = vld [vmem:[%s2959_s5 + $0x30] sm:$0xf] }
  0x45   : > { %v405_v11 = vrot.slane %v404_v2, 4  ;;  %v396_v16 = vsel %vm2982_vm2, %v391_v7, %v395_v0  ;;  %v624_v30 = vrot.slane %v622_v18, 5  ;;  %v633_v33 = vshrl.u32 %v2499_v15, 16  ;;  %v2542_v62 = vld [vmem:[%s2959_s5 + $0x34] sm:$0x1] }
  0x46   : > { %v630_v31 = vrot.slane %v628_v19, 5  ;;  %v611_v34 = vor.u32 %v610_v23, %v607_v17  ;;  %v636_v35 = vshll.u32 %v2499_v15, 16  ;;  %v642_v36 = vshll.u32 %v2500_v20, 16  ;;  %v2543_v5 = vld [vmem:[%s2959_s5 + $0x38] sm:$0xf] }
  0x47   : > { %269 = vrot.lane.b32.xlu1 %v2768_v58, %s2865_s6  ;;  %427 = vrot.lane.b32.xlu0 %v2461_v1, %s2868_s9  ;;  %v410_v21 = vsel %vm2982_vm2, %v405_v11, %v409_v3  ;;  %v647_v37 = vshrl.u32 %v2501_v26, 16  ;;  %v625_v38 = vor.u32 %v624_v30, %v621_v25  ;;  %v635_v39 = vrot.slane %v633_v33, 4  ;;  %v2539_v58 = vld [vmem:[%s2959_s5 + $0x28] sm:$0xf]  ;;  %v2775_v7 = vld [vmem:[%s2959_s5 + $0x70] ss:$8 sps:$4 sm:$0xff]  }
  0x48   : > { %v2462_v27 = vcombine.low %v396_v16, %v410_v21  ;;  %v650_v40 = vshll.u32 %v2501_v26, 16  ;;  %v656_v41 = vshll.u32 %v2502_v32, 16  ;;  %v612_v42 = vrot.slane %v611_v34, 4  ;;  %v2544_v11 = vld [vmem:[%s2959_s5 + $0x3c] sm:$0x1]  ;;  %s2875_s6 = smov 48  }
  0x49   : > { %v638_v43 = vrot.slane %v636_v35, 5  ;;  %v649_v44 = vrot.slane %v647_v37, 4  ;;  %v626_v46 = vrot.slane %v625_v38, 4  ;;  %v644_v50 = vrot.slane %v642_v36, 5  ;;  %v2774_v12 = vld [vmem:[%s2959_s5 + $0x38] ss:$8 sps:$4 sm:$0xff]  }
  0x4a   : > { %v652_v47 = vrot.slane %v650_v40, 5  ;;  %v617_v48 = vsel %vm2982_vm2, %v612_v42, %v616_v24  ;;  %v658_v53 = vrot.slane %v656_v41, 5  ;;  %v854_v63 = vshrl.u32 %v2539_v58, 16  ;;  %v2545_v16 = vld [vmem:[%s2959_s5 + $0x40] sm:$0xf] }
  0x4b   : > { %473 = vrot.lane.b32.xlu0 %v2769_v4, %s2866_s7  ;;  %429 = vrot.lane.b32.xlu1 %v2462_v27, %s2868_s9  ;;  %v639_v49 = vor.u32 %v638_v43, %v635_v39  ;;  %v631_v51 = vsel %vm2982_vm2, %v626_v46, %v630_v31  ;;  %v857_v0 = vshll.u32 %v2539_v58, 16  ;;  %v863_v2 = vshll.u32 %v2540_v59, 16  ;;  %v2546_v20 = vld [vmem:[%s2959_s5 + $0x44] sm:$0x1]  ;;  %v2776_v31 = vld [vmem:[%s2959_s5 + $0x80] ss:$8 sps:$4 sm:$0xff]  }
  0x4c   : > { %v653_v52 = vor.u32 %v652_v47, %v649_v44  ;;  %v2505_v54 = vcombine.low %v617_v48, %v631_v51  ;;  %v868_v3 = vshrl.u32 %v2541_v61, 16  ;;  %v871_v4 = vshll.u32 %v2541_v61, 16  ;;  %v2777_v35 = vld [vmem:[%s2959_s5] ss:$8 sps:$4 sm:$0xff]   ;;  %v2778_v42 = vld [vmem:[%s2959_s5 + $0x10] ss:$8 sps:$4 sm:$0xff]  }
  0x4d   : > { %v640_v55 = vrot.slane %v639_v49, 4  ;;  %v856_v8 = vrot.slane %v854_v63, 4  ;;  %v859_v9 = vrot.slane %v857_v0, 5  ;;  %v877_v10 = vshll.u32 %v2542_v62, 16  ;;  %230 = vst.msk [vmem:[#allocation2] sm:$0xff] %vm229_vm3, %v2777_v35  ;;  %231 = vst.msk [vmem:[#allocation2 + $0x8] sm:$0xff] %vm229_vm3, %v2778_v42 }
  0x4e   : > { %v654_v57 = vrot.slane %v653_v52, 4  ;;  %v865_v13 = vrot.slane %v863_v2, 5  ;;  %v870_v14 = vrot.slane %v868_v3, 4  ;;  %v873_v15 = vrot.slane %v871_v4, 5  ;;  %v2782_v47 = vld [vmem:[%s2959_s5 + $0x30] ss:$8 sps:$4 sm:$0xff]  }
  0x4f   : > { %519 = vrot.lane.b32.xlu0 %v2771_v22, %s2867_s8  ;;  %475 = vrot.lane.b32.xlu1 %v2770_v28, %s2866_s7  ;;  %v645_v60 = vsel %vm2982_vm2, %v640_v55, %v644_v50  ;;  %v882_v17 = vshrl.u32 %v2543_v5, 16  ;;  %v860_v18 = vor.u32 %v859_v9, %v856_v8  ;;  %v879_v19 = vrot.slane %v877_v10, 5  ;;  %v2783_v49 = vld [vmem:[%s3609_s1 + $0x10] ss:$0 sps:$4 sm:$0x33]   ;;  %233 = vst.msk [vmem:[#allocation2 + $0x18] sm:$0xff] %vm229_vm3, %v2782_v47 }
  0x50   : > { %v659_v1 = vsel %vm2982_vm2, %v654_v57, %v658_v53  ;;  %v885_v21 = vshll.u32 %v2543_v5, 16  ;;  %v891_v22 = vshll.u32 %v2544_v11, 16  ;;  %v874_v23 = vor.u32 %v873_v15, %v870_v14  ;;  %2700 = vmatprep.subr.msk.bf16.mxu0 %vm975_vm4, %v2783_v49  ;;  %v1129_v42 = vld [vmem:[#allocation3 + $0x14] sm:$0x1]  ;;  %v1144_v47 = vld [vmem:[#allocation3 + $0x3c] sm:$0x1] }
  0x51   : > { %v2506_v6 = vcombine.low %v645_v60, %v659_v1  ;;  %v884_v24 = vrot.slane %v882_v17, 4  ;;  %v896_v25 = vshrl.u32 %v2545_v16, 16  ;;  %v899_v26 = vshll.u32 %v2545_v16, 16  ;;  %s2876_s7 = smov 64  }
  0x52   : > { %v861_v27 = vrot.slane %v860_v18, 4  ;;  %v887_v28 = vrot.slane %v885_v21, 5  ;;  %v905_v30 = vshll.u32 %v2546_v20, 16  ;;  %v875_v32 = vrot.slane %v874_v23, 4 }
  0x53   : > { %676 = vrot.lane.b32.xlu0 %v2505_v54, %s2869_s10  ;;  %521 = vrot.lane.b32.xlu1 %v2772_v45, %s2867_s8  ;;  %v898_v33 = vrot.slane %v896_v25, 4  ;;  %v901_v34 = vrot.slane %v899_v26, 5  ;;  %v893_v38 = vrot.slane %v891_v22, 5  ;;  %v2780_v45 = vld [vmem:[%s2959_s5 + $0x20] ss:$8 sps:$4 sm:$0xff]   ;;  %v977_v52 = vsel %vm975_vm4, %v2783_v49, 0 }
  0x54   : > { %v866_v36 = vsel %vm2982_vm2, %v861_v27, %v865_v13  ;;  %v888_v37 = vor.u32 %v887_v28, %v884_v24  ;;  %v907_v39 = vrot.slane %v905_v30, 5  ;;  %v880_v40 = vsel %vm2982_vm2, %v875_v32, %v879_v19  ;;  %232 = vst.msk [vmem:[#allocation2 + $0x10] sm:$0xff] %vm229_vm3, %v2780_v45  ;;  %2673 = vmatpush3.bf16.msra.mxu0 %v977_v52  ;;  %v1106_v27 = vld [vmem:[#allocation3 + $0x18] sm:$0x1]  ;;  %v1132_v28 = vld [vmem:[#allocation3 + $0x1c] sm:$0x1] }
  0x55   : > { %v902_v41 = vor.u32 %v901_v34, %v898_v33  ;;  %v2549_v43 = vcombine.low %v866_v36, %v880_v40  ;;  %v2873_v25 = vmov 0   ;;  %vm1124_vm3 = vsmask.f32 7938  ;;  %v1100_v33 = vld [vmem:[#allocation3 + $0x8] sm:$0x1]  ;;  %s2874_s5 = smov 40  }
  0x56   : > { %v889_v44 = vrot.slane %v888_v37, 4  ;;  %1090 = vst.msk [vmem:[#allocation3] sm:$0xf] %vm1089_vm14, %v2873_v25  ;;  %1094 = vst.msk [vmem:[#allocation3 + $0x48] sm:$0xf] %vm1089_vm14, %v2873_v25  ;;  %v1107_v30 = vsel %vm3170_vm1, 0, %v1106_v27 }
  0x57   : > { %722 = vrot.lane.b32.xlu0 %v2773_v56, %s2870_s13  ;;  %678 = vrot.lane.b32.xlu1 %v2506_v6, %s2869_s10  ;;  %v903_v46 = vrot.slane %v902_v41, 4  ;;  %1092 = vst.msk [vmem:[#allocation3 + $0x4] sm:$0x1] %vm1091_vm15, %v2873_v25  ;;  %1095 = vst.msk [vmem:[#allocation3 + $0x4c] sm:$0x1] %vm1091_vm15, %v2873_v25  ;;  %v1101_v35 = vsel %vm3170_vm1, 0, %v1100_v33 }
  0x58   : > { %v894_v48 = vsel %vm2982_vm2, %v889_v44, %v893_v38  ;;  %vm3177_vm4 = vmand %vm1091_vm15, %vm1124_vm3  ;;  %1108 = vst [vmem:[#allocation3 + $0x18] sm:$0x1] %v1107_v30  ;;  %v1126_v34 = vld [vmem:[#allocation3 + $0xc] sm:$0x1]  ;;  %v1109_v37 = vld [vmem:[#allocation3 + $0x20] sm:$0x1] }
  0x59   : > { %v908_v50 = vsel %vm2982_vm2, %v903_v46, %v907_v39  ;;  %v1133_v32 = vsel %vm3177_vm4, 0, %v1132_v28  ;;  %v1127_v36 = vsel %vm3177_vm4, 0, %v1126_v34  ;;  %v1135_v38 = vld [vmem:[#allocation3 + $0x24] sm:$0x1]  ;;  %1102 = vst [vmem:[#allocation3 + $0x8] sm:$0x1] %v1101_v35 }
  0x5a   : > { %v2550_v51 = vcombine.low %v894_v48, %v908_v50  ;;  %1134 = vst [vmem:[#allocation3 + $0x1c] sm:$0x1] %v1133_v32  ;;  %1128 = vst [vmem:[#allocation3 + $0xc] sm:$0x1] %v1127_v36  ;;  %v1110_v39 = vsel %vm3170_vm1, 0, %v1109_v37  ;;  %v1136_v40 = vsel %vm3177_vm4, 0, %v1135_v38 }
  0x5b   : > { %768 = vrot.lane.b32.xlu0 %v2775_v7, %s2871_s22  ;;  %724 = vrot.lane.b32.xlu1 %v2774_v12, %s2870_s13  ;;  %v1103_v41 = vld [vmem:[#allocation3 + $0x10] sm:$0x1]  ;;  %1111 = vst [vmem:[#allocation3 + $0x20] sm:$0x1] %v1110_v39  ;;  %1137 = vst [vmem:[#allocation3 + $0x24] sm:$0x1] %v1136_v40 }
  0x5c   : > { %v1104_v44 = vsel %vm3170_vm1, 0, %v1103_v41  ;;  %v1130_v45 = vsel %vm3177_vm4, 0, %v1129_v42  ;;  %v1118_v46 = vld [vmem:[#allocation3 + $0x38] sm:$0x1]  ;;  %v1145_v49 = vsel %vm3177_vm4, 0, %v1144_v47  ;;  %vm1906_vm15 = vcmask 458112  }
  0x5d   : > { %1105 = vst [vmem:[#allocation3 + $0x10] sm:$0x1] %v1104_v44  ;;  %1131 = vst [vmem:[#allocation3 + $0x14] sm:$0x1] %v1130_v45  ;;  %v1119_v48 = vsel %vm3170_vm1, 0, %v1118_v46 }
  0x5e   : > { %v1112_v50 = vld [vmem:[#allocation3 + $0x28] sm:$0x1]  ;;  %1120 = vst [vmem:[#allocation3 + $0x38] sm:$0x1] %v1119_v48  ;;  %1146 = vst [vmem:[#allocation3 + $0x3c] sm:$0x1] %v1145_v49 }
  0x5f   : > { %925 = vrot.lane.b32.xlu0 %v2549_v43, %s2872_s23  ;;  %770 = vrot.lane.b32.xlu1 %v2776_v31, %s2871_s22  ;;  %v1113_v52 = vsel %vm3170_vm1, 0, %v1112_v50  ;;  %s2877_s22 = smov 56  }
  0x60   : > { %1114 = vst [vmem:[#allocation3 + $0x28] sm:$0x1] %v1113_v52 }
  0x61   : > { %v1235_v28 = vld [vmem:[#allocation3 + $0xc] sm:$0x1] }
  0x62   : > { %v1250_v36 = vld [vmem:[#allocation3 + $0x20] sm:$0xf]  ;;  %v1253_v39 = vld [vmem:[#allocation3 + $0x24] sm:$0x1] }
  0x63   : > { %927 = vrot.lane.b32.xlu1 %v2550_v51, %s2872_s23  ;;  %v1138_v51 = vld [vmem:[#allocation3 + $0x2c] sm:$0x1] }
  0x64   : > { %v1238_v47 = vld [vmem:[#allocation3 + $0x10] sm:$0xf]  ;;  %v1241_v48 = vld [vmem:[#allocation3 + $0x14] sm:$0x1] }
  0x8d   : > { %v264_v53 = vpop.permute.xlu0 %263 }
  0x8e   : > { %276 = vst.msk [vmem:[#allocation2] sm:$0xff] %vm275_vm5, %v264_v53  ;;  %v472_v54 = vpop.permute.xlu1 %471  ;;  %v1139_v53 = vsel %vm3177_vm4, 0, %v1138_v51 }
  0x8f   : > { %1140 = vst [vmem:[#allocation3 + $0x2c] sm:$0x1] %v1139_v53 }
  0x91   : > { %v266_v55 = vpop.permute.xlu0 %265 }
  0x92   : > { %277 = vst.msk [vmem:[#allocation2 + $0x8] sm:$0xff] %vm275_vm5, %v266_v55  ;;  %v518_v56 = vpop.permute.xlu1 %517  ;;  %v1147_v55 = vld [vmem:[#allocation3 + $0x44] sm:$0x1] }
  0x95   : > { %v470_v57 = vpop.permute.xlu0 %469 }
  0x99   : > { %v516_v59 = vpop.permute.xlu0 %515 }
  0x9b   : > { %v424_v58 = vpop.permute.xlu1 %423 }
  0x9c   : > { %436 = vst.msk [vmem:[#allocation2] sm:$0xff] %vm435_vm6, %v424_v58  ;;  %v1115_v58 = vld [vmem:[#allocation3 + $0x30] sm:$0x1] }
  0x9d   : > { %482 = vst.msk [vmem:[#allocation2] sm:$0xff] %vm481_vm7, %v470_v57  ;;  %v1148_v57 = vsel %vm3177_vm4, 0, %v1147_v55 }
  0x9e   : > { %528 = vst.msk [vmem:[#allocation2] sm:$0xff] %vm527_vm8, %v516_v59  ;;  %v1141_v59 = vld [vmem:[#allocation3 + $0x34] sm:$0x1]  ;;  %1149 = vst [vmem:[#allocation3 + $0x44] sm:$0x1] %v1148_v57 }
  0x9f   : > { %v426_v60 = vpop.permute.xlu1 %425  ;;  %v1474_v57 = vld [vmem:[#allocation3] sm:$0xe] }
  0xa0   : > { %437 = vst.msk [vmem:[#allocation2 + $0x8] sm:$0xff] %vm435_vm6, %v426_v60  ;;  %v1116_v60 = vsel %vm3170_vm1, 0, %v1115_v58  ;;  %v1475_v58 = vld [vmem:[#allocation3 + $0x4] sm:$0x1] }
  0xa1   : > { %483 = vst.msk [vmem:[#allocation2 + $0x8] sm:$0xff] %vm481_vm7, %v472_v54  ;;  %v1121_v54 = vld [vmem:[#allocation3 + $0x40] sm:$0x1]  ;;  %1117 = vst [vmem:[#allocation3 + $0x30] sm:$0x1] %v1116_v60 }
  0xa2   : > { %529 = vst.msk [vmem:[#allocation2 + $0x8] sm:$0xff] %vm527_vm8, %v518_v56  ;;  %v1122_v56 = vsel %vm3170_vm1, 0, %v1121_v54 }
  0xa3   : > { %1123 = vst [vmem:[#allocation3 + $0x40] sm:$0x1] %v1122_v56 }
  0xa5   : > { %v673_v61 = vpop.permute.xlu0 %672 }
  0xa6   : > { %685 = vst.msk [vmem:[#allocation2] sm:$0xff] %vm684_vm9, %v673_v61  ;;  %v1142_v61 = vsel %vm3177_vm4, 0, %v1141_v59  ;;  %v1318_v59 = vld [vmem:[#allocation3 + $0x4] sm:$0x1] }
  0xa7   : > { %1143 = vst [vmem:[#allocation3 + $0x34] sm:$0x1] %v1142_v61 }
  0xa9   : > { %v719_v62 = vpop.permute.xlu0 %718  ;;  %v675_v63 = vpop.permute.xlu1 %674 }
  0xaa   : > { %731 = vst.msk [vmem:[#allocation2] sm:$0xff] %vm730_vm10, %v719_v62  ;;  %v3220_v62 = vld [vmem:[%s3611_s3] ss:$0 sm:$0xff] }
  0xab   : > { %686 = vst.msk [vmem:[#allocation2 + $0x8] sm:$0xff] %vm684_vm9, %v675_v63 }
  0xad   : > { %v765_v0 = vpop.permute.xlu0 %764  ;;  %v721_v1 = vpop.permute.xlu1 %720 }
  0xae   : > { %777 = vst.msk [vmem:[#allocation2] sm:$0xff] %vm776_vm11, %v765_v0 }
  0xaf   : > { %732 = vst.msk [vmem:[#allocation2 + $0x8] sm:$0xff] %vm730_vm10, %v721_v1 }
  0xb1   : > { %v922_v2 = vpop.permute.xlu0 %921  ;;  %v767_v3 = vpop.permute.xlu1 %766 }
  0xb2   : > { %934 = vst.msk [vmem:[#allocation2] sm:$0xff] %vm933_vm12, %v922_v2 }
  0xb3   : > { %778 = vst.msk [vmem:[#allocation2 + $0x8] sm:$0xff] %vm776_vm11, %v767_v3 }
  0xb5   : > { %v924_v4 = vpop.permute.xlu0 %923  ;;  %v268_v5 = vpop.permute.xlu1 %267 }
  0xb6   : > { %935 = vst.msk [vmem:[#allocation2 + $0x8] sm:$0xff] %vm933_vm12, %v924_v4 }
  0xb7   : > { %278 = vst.msk [vmem:[#allocation2 + $0x10] sm:$0xff] %vm275_vm5, %v268_v5 }
  0xb9   : > { %v938_v6 = vld [vmem:[#allocation2] sm:$0xff]  ;;  %v270_v7 = vpop.permute.xlu1 %269  ;;  %v428_v8 = vpop.permute.xlu0 %427 }
  0xba   : > { %2674 = vmatprep.mubr.msk.bf16.mxu0 %vm962_vm13, %v938_v6  ;;  %279 = vst.msk [vmem:[#allocation2 + $0x18] sm:$0xff] %vm275_vm5, %v270_v7  ;;  %vm3193_vm5 = vmand %vm1089_vm14, %vm1124_vm3  ;;  %vm1860_vm14 = vcmask 392512   ;;  %vm2206_vm3 = vcmask 588800  }
  0xbb   : > { %438 = vst.msk [vmem:[#allocation2 + $0x10] sm:$0xff] %vm435_vm6, %v428_v8 }
  0xbd   : > { %v939_v9 = vld [vmem:[#allocation2 + $0x8] sm:$0xff]  ;;  %v474_v10 = vpop.permute.xlu0 %473  ;;  %v430_v11 = vpop.permute.xlu1 %429 }
  0xbe   : > { %2675 = vmatmul.mubr.msk.bf16.vlgmr.msra.gmra.mrb[0].mxu0 %vm962_vm13, %v939_v9  ;;  %484 = vst.msk [vmem:[#allocation2 + $0x10] sm:$0xff] %vm481_vm7, %v474_v10 }
  0xbf   : > { %439 = vst.msk [vmem:[#allocation2 + $0x18] sm:$0xff] %vm435_vm6, %v430_v11  ;;  %vm1506_vm6 = vcmask 1042432  }
  0xc1   : > { %v520_v12 = vpop.permute.xlu0 %519  ;;  %v476_v13 = vpop.permute.xlu1 %475 }
  0xc2   : > { %530 = vst.msk [vmem:[#allocation2 + $0x10] sm:$0xff] %vm527_vm8, %v520_v12 }
  0xc3   : > { %485 = vst.msk [vmem:[#allocation2 + $0x18] sm:$0xff] %vm481_vm7, %v476_v13  ;;  %v1317_v13 = vld [vmem:[#allocation3] sm:$0xf]  ;;  %vm1507_vm7 = vcmask 1046532  }
  0xc4   : > { %v1337_v31 = vshll.u32 %v1317_v13, 16 }
  0xc5   : > { %v677_v14 = vpop.permute.xlu0 %676  ;;  %v522_v15 = vpop.permute.xlu1 %521 }
  0xc6   : > { %687 = vst.msk [vmem:[#allocation2 + $0x10] sm:$0xff] %vm684_vm9, %v677_v14  ;;  %v1339_v61 = vrot.slane %v1337_v31, 5 }
  0xc7   : > { %531 = vst.msk [vmem:[#allocation2 + $0x18] sm:$0xff] %vm527_vm8, %v522_v15  ;;  %vm3254_vm8 = vmor %vm1506_vm6, %vm1507_vm7 }
  0xc9   : > { %v723_v16 = vpop.permute.xlu0 %722  ;;  %v679_v17 = vpop.permute.xlu1 %678 }
  0xca   : > { %733 = vst.msk [vmem:[#allocation2 + $0x10] sm:$0xff] %vm730_vm10, %v723_v16 }
  0xcb   : > { %688 = vst.msk [vmem:[#allocation2 + $0x18] sm:$0xff] %vm684_vm9, %v679_v17  ;;  %v1244_v17 = vld [vmem:[#allocation3 + $0x18] sm:$0xf]  ;;  %vm1312_vm9 = vcmask 64512  }
  0xcd   : > { %v769_v18 = vpop.permute.xlu0 %768  ;;  %v725_v19 = vpop.permute.xlu1 %724 }
  0xce   : > { %779 = vst.msk [vmem:[#allocation2 + $0x10] sm:$0xff] %vm776_vm11, %v769_v18  ;;  %v1247_v18 = vld [vmem:[#allocation3 + $0x1c] sm:$0x1] }
  0xcf   : > { %734 = vst.msk [vmem:[#allocation2 + $0x18] sm:$0xff] %vm730_vm10, %v725_v19  ;;  %vm2219_vm10 = vcmask 1043456  }
  0xd1   : > { %v926_v20 = vpop.permute.xlu0 %925  ;;  %v771_v21 = vpop.permute.xlu1 %770 }
  0xd2   : > { %936 = vst.msk [vmem:[#allocation2 + $0x10] sm:$0xff] %vm933_vm12, %v926_v20 }
  0xd3   : > { %780 = vst.msk [vmem:[#allocation2 + $0x18] sm:$0xff] %vm776_vm11, %v771_v21  ;;  %vm1565_vm11 = vcmask 195712  }
  0xd5   : > { %v928_v22 = vpop.permute.xlu1 %927 }
  0xd6   : > { %937 = vst.msk [vmem:[#allocation2 + $0x18] sm:$0xff] %vm933_vm12, %v928_v22  ;;  %v1232_v22 = vld [vmem:[#allocation3 + $0x8] sm:$0xf]  ;;  %vm1610_vm12 = vcmask 261312  }
  0xd9   : > { %v940_v23 = vld [vmem:[#allocation2 + $0x10] sm:$0xff] }
  0xda   : > { %2678 = vmatprep.mubr.msk.bf16.mxu0 %vm962_vm13, %v940_v23 }
  0xdd   : > { %v941_v24 = vld [vmem:[#allocation2 + $0x18] sm:$0xff] }
  0xde   : > { %2679 = vmatmul.mubr.msk.bf16.gmra.mrb[4].mxu0 %vm962_vm13, %v941_v24  ;;  %v1334_v24 = vshrl.u32 %v1317_v13, 16  ;;  %vm1767_vm13 = vcmask 326912  }
  0xe0   : > { %v1336_v60 = vrot.slane %v1334_v24, 4 }
 0x191   : > { %v3222_v63 = vpop.f32.mrb[0].mxu0 }
 0x192   : > { %v1051_v0 = vadd.f32 %v3222_v63, %v3220_v62  ;;  %v3226_v1 = vpop.f32.mrb[1].mxu0 }
 0x193   : > { %v1049_v2 = vadd.f32 %v3220_v62, %v3226_v1  ;;  %v3230_v3 = vpop.f32.mrb[2].mxu0 }
 0x194   : > { %v1059_v4 = vmax.f32 %v1051_v0, 0.0  ;;  %v1052_v5 = vadd.f32 %v3230_v3, %v3220_v62  ;;  %v3234_v6 = vpop.f32.mrb[3].mxu0  ;;  %v2575_v0 = vrot.slane %v1474_v57, 9 }
 0x195   : > { %v1057_v7 = vmax.f32 %v1049_v2, 0.0  ;;  %v1050_v8 = vadd.f32 %v3220_v62, %v3234_v6  ;;  %v1511_v2 = vrot.slane %v1475_v58, 5 }
 0x196   : > { %v2645_v9 = vpack.c.bf16 %v1059_v4, %v1059_v4  ;;  %v1060_v10 = vmax.f32 %v1052_v5, 0.0  ;;  %v1343_v4 = vshll.u32 %v1318_v59, 16 }
 0x197   : > { %v2643_v11 = vpack.c.bf16 %v1057_v7, %v1057_v7  ;;  %v1058_v12 = vmax.f32 %v1050_v8, 0.0  ;;  %v1340_v8 = vor.u32 %v1339_v61, %v1336_v60 }
 0x198   : > { %v1167_v14 = vshrl.u32 %v2645_v9, 16  ;;  %v1170_v15 = vshll.u32 %v2645_v9, 16  ;;  %v2646_v16 = vpack.c.bf16 %v1060_v10, %v1060_v10 }
 0x199   : > { %v1151_v19 = vshrl.u32 %v2643_v11, 16  ;;  %v2644_v20 = vpack.c.bf16 %v1058_v12, %v1058_v12  ;;  %v1154_v27 = vshll.u32 %v2643_v11, 16 }
 0x19a   : > { %v1169_v21 = vrot.slane %v1167_v14, 7  ;;  %v1175_v23 = vshrl.u32 %v2646_v16, 16  ;;  %v1178_v35 = vshll.u32 %v2646_v16, 16 }
 0x19b   : > { %v1153_v25 = vrot.slane %v1151_v19, 7  ;;  %v1159_v30 = vshrl.u32 %v2644_v20, 16  ;;  %v1162_v41 = vshll.u32 %v2644_v20, 16 }
 0x19c   : > { %v1172_v32 = vor.u32 %v1170_v15, %v1169_v21  ;;  %v1173_v33 = vrot.slane %v1169_v21, 4  ;;  %v1177_v34 = vrot.slane %v1175_v23, 7 }
 0x19d   : > { %v1156_v37 = vor.u32 %v1154_v27, %v1153_v25  ;;  %v1157_v38 = vrot.slane %v1153_v25, 4  ;;  %v1161_v40 = vrot.slane %v1159_v30, 7 }
 0x19e   : > { %v1245_v42 = vsel %vm3193_vm5, %v1172_v32, %v1244_v17  ;;  %v1248_v44 = vsel %vm3170_vm1, %v1173_v33, %v1247_v18  ;;  %v1180_v45 = vor.u32 %v1178_v35, %v1177_v34  ;;  %v1181_v46 = vrot.slane %v1177_v34, 4 }
 0x19f   : > { %1246 = vst [vmem:[#allocation3 + $0x18] sm:$0xf] %v1245_v42  ;;  %1249 = vst [vmem:[#allocation3 + $0x1c] sm:$0x1] %v1248_v44  ;;  %v1233_v49 = vsel %vm3193_vm5, %v1156_v37, %v1232_v22  ;;  %v1236_v50 = vsel %vm3170_vm1, %v1157_v38, %v1235_v28  ;;  %v1164_v51 = vor.u32 %v1162_v41, %v1161_v40  ;;  %v1165_v52 = vrot.slane %v1161_v40, 4 }
 0x1a0   : > { %1234 = vst [vmem:[#allocation3 + $0x8] sm:$0xf] %v1233_v49  ;;  %1237 = vst [vmem:[#allocation3 + $0xc] sm:$0x1] %v1236_v50  ;;  %v1251_v53 = vsel %vm3193_vm5, %v1180_v45, %v1250_v36  ;;  %v1254_v54 = vsel %vm3170_vm1, %v1181_v46, %v1253_v39  ;;  %v3259_v18 = vrot.slane %v1340_v8, 4  ;;  %v3266_v35 = vrot.slane %v1343_v4, 5 }
 0x1a1   : > { %1252 = vst [vmem:[#allocation3 + $0x20] sm:$0xf] %v1251_v53  ;;  %1255 = vst [vmem:[#allocation3 + $0x24] sm:$0x1] %v1254_v54  ;;  %v1239_v55 = vsel %vm3193_vm5, %v1164_v51, %v1238_v47  ;;  %v1242_v56 = vsel %vm3170_vm1, %v1165_v52, %v1241_v48  ;;  %v1512_v37 = vsel %vm3254_vm8, %v2575_v0, %v1511_v2  ;;  %v3274_v47 = vld [vmem:[#allocation3 + $0x48] sm:$0xf] }
 0x1a2   : > { %1240 = vst [vmem:[#allocation3 + $0x10] sm:$0xf] %v1239_v55  ;;  %1243 = vst [vmem:[#allocation3 + $0x14] sm:$0x1] %v1242_v56  ;;  %v1346_v8 = vsel %vm2982_vm2, %v3259_v18, %v3266_v35 }
 0x1a6   : > { %v1776_v5 = vld [vmem:[#allocation3 + $0x18] sm:$0xe]  ;;  %v1777_v7 = vld [vmem:[#allocation3 + $0x1c] sm:$0x1] }
 0x1a7   : > { %v2597_v10 = vrot.slane %v1776_v5, 9  ;;  %v1814_v11 = vrot.slane %v1777_v7, 5  ;;  %v1480_v23 = vld [vmem:[#allocation3 + $0x18] sm:$0xe]  ;;  %v1481_v25 = vld [vmem:[#allocation3 + $0x1c] sm:$0x1] }
 0x1a8   : > { %v2784_v12 = vld [vmem:[#allocation3 + $0x18] ss:$8 sps:$4 sm:$0xff]   ;;  %v1779_v15 = vld [vmem:[#allocation3 + $0x24] sm:$0x1]  ;;  %v2578_v30 = vrot.slane %v1480_v23, 9  ;;  %v1523_v32 = vrot.slane %v1481_v25, 5 }
 0x1a9   : > { %v1778_v13 = vld [vmem:[#allocation3 + $0x20] sm:$0xe]  ;;  %v2785_v14 = vld [vmem:[#allocation3 + $0x8] ss:$8 sps:$4 sm:$0xff]   ;;  %1600 = vrot.lane.b32.xlu1 %v2784_v12, %s2870_s13  ;;  %v1818_v17 = vrot.slane %v1779_v15, 5  ;;  %v1815_v19 = vsel %vm3254_vm8, %v2597_v10, %v1814_v11 }
 0x1aa   : > { %v2598_v16 = vrot.slane %v1778_v13, 9  ;;  %1598 = vrot.lane.b32.xlu0 %v2785_v14, %s2870_s13  ;;  %v2786_v20 = vld [vmem:[#allocation3 + $0x10] ss:$8 sps:$4 sm:$0xff]   ;;  %v1479_v22 = vld [vmem:[#allocation3 + $0x14] sm:$0x1]  ;;  %v1524_v48 = vsel %vm3254_vm8, %v2578_v30, %v1523_v32 }
 0x1ab   : > { %v1478_v21 = vld [vmem:[#allocation3 + $0x10] sm:$0xe]  ;;  %v1519_v28 = vrot.slane %v1479_v22, 5  ;;  %v1476_v33 = vld [vmem:[#allocation3 + $0x8] sm:$0xe] }
 0x1ac   : > { %v1819_v24 = vsel %vm3254_vm8, %v2598_v16, %v1818_v17  ;;  %v2577_v27 = vrot.slane %v1478_v21, 9  ;;  %v1477_v34 = vld [vmem:[#allocation3 + $0xc] sm:$0x1]  ;;  %v2576_v38 = vrot.slane %v1476_v33, 9  ;;  %v1772_v40 = vld [vmem:[#allocation3 + $0x8] sm:$0xe] }
 0x1ad   : > { %v2604_v31 = vcombine.low %v1815_v19, %v1819_v24  ;;  %v1515_v39 = vrot.slane %v1477_v34, 5  ;;  %v1773_v41 = vld [vmem:[#allocation3 + $0xc] sm:$0x1]  ;;  %v1774_v42 = vld [vmem:[#allocation3 + $0x10] sm:$0xe]  ;;  %v2595_v45 = vrot.slane %v1772_v40, 9 }
 0x1ae   : > { %v1520_v36 = vsel %vm3254_vm8, %v2577_v27, %v1519_v28  ;;  %1894 = vrot.lane.b32.xlu0 %v2786_v20, %s2875_s6  ;;  %v1775_v44 = vld [vmem:[#allocation3 + $0x14] sm:$0x1]  ;;  %v1806_v46 = vrot.slane %v1773_v41, 5  ;;  %v2596_v50 = vrot.slane %v1774_v42, 9  ;;  %v2068_v52 = vld [vmem:[#allocation3 + $0x10] sm:$0xe] }
 0x1af   : > { %1850 = vrot.lane.b32.xlu1 %v2604_v31, %s2874_s5  ;;  %v1516_v49 = vsel %vm3254_vm8, %v2576_v38, %v1515_v39  ;;  %v1810_v51 = vrot.slane %v1775_v44, 5  ;;  %v2069_v53 = vld [vmem:[#allocation3 + $0x14] sm:$0x1]  ;;  %v2584_v54 = vcombine.low %v1520_v36, %v1524_v48  ;;  %v2070_v56 = vld [vmem:[#allocation3 + $0x18] sm:$0xe]  ;;  %v2615_v58 = vrot.slane %v2068_v52, 9 }
 0x1b0   : > { %v2583_v55 = vcombine.low %v1512_v37, %v1516_v49  ;;  %v2071_v57 = vld [vmem:[#allocation3 + $0x1c] sm:$0x1]  ;;  %v2102_v59 = vrot.slane %v2069_v53, 5  ;;  %v2616_v61 = vrot.slane %v2070_v56, 9  ;;  %v1319_v2 = vld [vmem:[#allocation3 + $0x8] sm:$0xf]  ;;  %v1807_v7 = vsel %vm3254_vm8, %v2595_v45, %v1806_v46 }
 0x1b1   : > { %v1811_v60 = vsel %vm3254_vm8, %v2596_v50, %v1810_v51  ;;  %v2106_v0 = vrot.slane %v2071_v57, 5  ;;  %v1320_v4 = vld [vmem:[#allocation3 + $0xc] sm:$0x1]  ;;  %v3282_v5 = vpop.f32.mrb[4].mxu0  ;;  %v1348_v10 = vshrl.u32 %v1319_v2, 16  ;;  %v1351_v11 = vshll.u32 %v1319_v2, 16 }
 0x1b2   : > { %1553 = vrot.lane.b32.xlu0 %v2583_v55, %s2867_s8  ;;  %v1055_v12 = vadd.f32 %v3282_v5, %v3220_v62  ;;  %v3294_v13 = vpop.f32.mrb[5].mxu0  ;;  %v2603_v14 = vcombine.low %v1807_v7, %v1811_v60  ;;  %v1357_v15 = vshll.u32 %v1320_v4, 16  ;;  %v1615_v16 = vld [vmem:[#allocation3 + $0x8] sm:$0xf]  ;;  %v2026_v17 = vshrl.u32 %v3274_v47, 16 }
 0x1b3   : > { %1555 = vrot.lane.b32.xlu1 %v2584_v54, %s2867_s8  ;;  %v1053_v19 = vadd.f32 %v3220_v62, %v3294_v13  ;;  %v3299_v20 = vpop.f32.mrb[6].mxu0  ;;  %v2103_v18 = vsel %vm3254_vm8, %v2615_v58, %v2102_v59  ;;  %v1350_v21 = vrot.slane %v1348_v10, 4  ;;  %v1353_v22 = vrot.slane %v1351_v11, 5  ;;  %v3312_v33 = vld [vmem:[#allocation3 + $0xc] sm:$0x1] }
 0x1b4   : > { %v1063_v23 = vmax.f32 %v1055_v12, 0.0  ;;  %v1056_v24 = vadd.f32 %v3299_v20, %v3220_v62  ;;  %v3305_v25 = vpop.f32.mrb[7].mxu0  ;;  %v2107_v27 = vsel %vm3254_vm8, %v2616_v61, %v2106_v0  ;;  %v1632_v28 = vshrl.u32 %v1615_v16, 16  ;;  %v1268_v49 = vld [vmem:[#allocation3 + $0x38] sm:$0xf] }
 0x1b5   : > { %v1061_v30 = vmax.f32 %v1053_v19, 0.0  ;;  %v1054_v31 = vadd.f32 %v3220_v62, %v3305_v25  ;;  %v1354_v32 = vor.u32 %v1353_v22, %v1350_v21  ;;  %v1635_v34 = vshll.u32 %v1615_v16, 16  ;;  %v1271_v50 = vld [vmem:[#allocation3 + $0x3c] sm:$0x1]  ;;  %v1256_v56 = vld [vmem:[#allocation3 + $0x28] sm:$0xf] }
 0x1b6   : > { %1848 = vrot.lane.b32.xlu0 %v2603_v14, %s2874_s5  ;;  %v2649_v35 = vpack.c.bf16 %v1063_v23, %v1063_v23  ;;  %v1064_v36 = vmax.f32 %v1056_v24, 0.0  ;;  %v2623_v37 = vcombine.low %v2103_v18, %v2107_v27  ;;  %v1359_v38 = vrot.slane %v1357_v15, 5  ;;  %v1617_v59 = vld [vmem:[#allocation3 + $0x10] sm:$0xf]  ;;  %v1259_v61 = vld [vmem:[#allocation3 + $0x2c] sm:$0x1] }
 0x1b7   : > { %v2647_v39 = vpack.c.bf16 %v1061_v30, %v1061_v30  ;;  %v1062_v40 = vmax.f32 %v1054_v31, 0.0  ;;  %v1355_v41 = vrot.slane %v1354_v32, 4  ;;  %v3314_v42 = vrot.slane %v1632_v28, 4  ;;  %v1274_v12 = vld [vmem:[#allocation3 + $0x40] sm:$0xf] }
 0x1b8   : > { %v1199_v44 = vshrl.u32 %v2649_v35, 16  ;;  %v2650_v45 = vpack.c.bf16 %v1064_v36, %v1064_v36  ;;  %v3316_v46 = vrot.slane %v1635_v34, 5  ;;  %v1641_v62 = vshll.u32 %v3312_v33, 16  ;;  %v1277_v14 = vld [vmem:[#allocation3 + $0x44] sm:$0x1] }
 0x1b9   : > { %v1202_v48 = vshll.u32 %v2649_v35, 16  ;;  %v1183_v51 = vshrl.u32 %v2647_v39, 16  ;;  %v2648_v52 = vpack.c.bf16 %v1062_v40, %v1062_v40  ;;  %v1360_v53 = vsel %vm2982_vm2, %v1355_v41, %v1359_v38  ;;  %v3325_v22 = vld [vmem:[#allocation3 + $0x4c] sm:$0x1]  ;;  %v1262_v28 = vld [vmem:[#allocation3 + $0x30] sm:$0xf] }
 0x1ba   : > { %2144 = vrot.lane.b32.xlu0 %v2623_v37, %s2876_s7  ;;  %v1201_v54 = vrot.slane %v1199_v44, 7  ;;  %v1186_v55 = vshll.u32 %v2647_v39, 16  ;;  %v1207_v57 = vshrl.u32 %v2650_v45, 16  ;;  %v1210_v58 = vshll.u32 %v2650_v45, 16  ;;  %v1265_v30 = vld [vmem:[#allocation3 + $0x34] sm:$0x1] }
 0x1bb   : > { %v1185_v60 = vrot.slane %v1183_v51, 7  ;;  %v1191_v0 = vshrl.u32 %v2648_v52, 16  ;;  %v1194_v2 = vshll.u32 %v2648_v52, 16  ;;  %v2571_v4 = vcombine.low %v1346_v8, %v1360_v53  ;;  %v1619_v36 = vld [vmem:[#allocation3 + $0x18] sm:$0xf] }
 0x1bc   : > { %v1204_v7 = vor.u32 %v1202_v48, %v1201_v54  ;;  %v1205_v10 = vrot.slane %v1201_v54, 4  ;;  %v1209_v11 = vrot.slane %v1207_v57, 7  ;;  %v1638_v15 = vor.u32 %v3316_v46, %v3314_v42  ;;  %v1621_v37 = vld [vmem:[#allocation3 + $0x20] sm:$0xf]  ;;  %v1618_v40 = vld [vmem:[#allocation3 + $0x14] sm:$0x1] }
 0x1bd   : > { %v1188_v16 = vor.u32 %v1186_v55, %v1185_v60  ;;  %v1189_v19 = vrot.slane %v1185_v60, 4  ;;  %v1193_v18 = vrot.slane %v1191_v0, 7  ;;  %v1646_v21 = vshrl.u32 %v1617_v59, 16  ;;  %v1620_v41 = vld [vmem:[#allocation3 + $0x1c] sm:$0x1] }
 0x1be   : > { %1457 = vrot.lane.b32.xlu0 %v2571_v4, %s2868_s9  ;;  %v1269_v8 = vsel %vm3193_vm5, %v1204_v7, %v1268_v49  ;;  %v1272_v23 = vsel %vm3170_vm1, %v1205_v10, %v1271_v50  ;;  %v1212_v24 = vor.u32 %v1210_v58, %v1209_v11  ;;  %v1213_v27 = vrot.slane %v1209_v11, 4  ;;  %v1622_v49 = vld [vmem:[#allocation3 + $0x24] sm:$0x1]  ;;  %v1911_v50 = vld [vmem:[#allocation3 + $0x10] sm:$0xf] }
 0x1bf   : > { %1270 = vst [vmem:[#allocation3 + $0x38] sm:$0xf] %v1269_v8  ;;  %1273 = vst [vmem:[#allocation3 + $0x3c] sm:$0x1] %v1272_v23  ;;  %v1257_v31 = vsel %vm3193_vm5, %v1188_v16, %v1256_v56  ;;  %v1260_v32 = vsel %vm3170_vm1, %v1189_v19, %v1259_v61  ;;  %v1196_v34 = vor.u32 %v1194_v2, %v1193_v18  ;;  %v1197_v35 = vrot.slane %v1193_v18, 4 }
 0x1c0   : > { %1258 = vst [vmem:[#allocation3 + $0x28] sm:$0xf] %v1257_v31  ;;  %1261 = vst [vmem:[#allocation3 + $0x2c] sm:$0x1] %v1260_v32  ;;  %v1275_v38 = vsel %vm3193_vm5, %v1212_v24, %v1274_v12  ;;  %v1278_v39 = vsel %vm3170_vm1, %v1213_v27, %v1277_v14  ;;  %v2029_v42 = vshll.u32 %v3274_v47, 16  ;;  %v2035_v44 = vshll.u32 %v3325_v22, 16 }
 0x1c1   : > { %1276 = vst [vmem:[#allocation3 + $0x40] sm:$0xf] %v1275_v38  ;;  %1279 = vst [vmem:[#allocation3 + $0x44] sm:$0x1] %v1278_v39  ;;  %v1263_v45 = vsel %vm3193_vm5, %v1196_v34, %v1262_v28  ;;  %v1266_v46 = vsel %vm3170_vm1, %v1197_v35, %v1265_v30  ;;  %v1649_v48 = vshll.u32 %v1617_v59, 16  ;;  %v3347_v51 = vrot.slane %v2026_v17, 4 }
 0x1c2   : > { %1264 = vst [vmem:[#allocation3 + $0x30] sm:$0xf] %v1263_v45  ;;  %1267 = vst [vmem:[#allocation3 + $0x34] sm:$0x1] %v1266_v46  ;;  %v1648_v52 = vrot.slane %v1646_v21, 4  ;;  %v1660_v53 = vshrl.u32 %v1619_v36, 16 }
 0x1c3   : > { %v1663_v54 = vshll.u32 %v1619_v36, 16  ;;  %v1674_v55 = vshrl.u32 %v1621_v37, 16  ;;  %v1912_v56 = vld [vmem:[#allocation3 + $0x14] sm:$0x1]  ;;  %v1639_v57 = vrot.slane %v1638_v15, 4  ;;  %v1643_v43 = vrot.slane %v1641_v62, 5 }
 0x1c4   : > { %v1651_v26 = vrot.slane %v1649_v48, 5  ;;  %v1677_v58 = vshll.u32 %v1621_v37, 16  ;;  %v1655_v59 = vshll.u32 %v1618_v40, 16  ;;  %v1662_v60 = vrot.slane %v1660_v53, 4  ;;  %v2792_v47 = vld [vmem:[#allocation3] ss:$8 sps:$4 sm:$0xff]  }
 0x1c5   : > { %v1665_v61 = vrot.slane %v1663_v54, 5  ;;  %v1676_v0 = vrot.slane %v1674_v55, 4  ;;  %v1669_v17 = vshll.u32 %v1620_v41, 16  ;;  %v1683_v4 = vshll.u32 %v1622_v49, 16  ;;  %1313 = vst.msk [vmem:[#allocation4] sm:$0xff] %vm1312_vm9, %v2792_v47 }
 0x1c6   : > { %v1679_v2 = vrot.slane %v1677_v58, 5  ;;  %v1928_v7 = vshrl.u32 %v1911_v50, 16  ;;  %v1652_v10 = vor.u32 %v1651_v26, %v1648_v52  ;;  %v1931_v12 = vshll.u32 %v1911_v50, 16  ;;  %v1913_v62 = vld [vmem:[#allocation3 + $0x18] sm:$0xf] }
 0x1c7   : > { %v1666_v11 = vor.u32 %v1665_v61, %v1662_v60  ;;  %v1937_v14 = vshll.u32 %v1912_v56, 16  ;;  %v2787_v15 = vld [vmem:[#allocation3 + $0x20] ss:$8 sps:$4 sm:$0xff]   ;;  %v1657_v16 = vrot.slane %v1655_v59, 5  ;;  %v1914_v19 = vld [vmem:[#allocation3 + $0x1c] sm:$0x1]  ;;  %v1644_v8 = vsel %vm2982_vm2, %v1639_v57, %v1643_v43 }
 0x1c8   : > { %v1680_v33 = vor.u32 %v1679_v2, %v1676_v0  ;;  %v3352_v18 = vrot.slane %v2029_v42, 5  ;;  %1896 = vrot.lane.b32.xlu1 %v2787_v15, %s2875_s6  ;;  %v1321_v23 = vld [vmem:[#allocation3 + $0x10] sm:$0xf]  ;;  %v1653_v24 = vrot.slane %v1652_v10, 4  ;;  %v1671_v28 = vrot.slane %v1669_v17, 5 }
 0x1c9   : > { %v2788_v21 = vld [vmem:[#allocation3 + $0x28] ss:$8 sps:$4 sm:$0xff]   ;;  %v1667_v27 = vrot.slane %v1666_v11, 4  ;;  %v1685_v30 = vrot.slane %v1683_v4, 5  ;;  %v1322_v31 = vld [vmem:[#allocation3 + $0x14] sm:$0x1] }
 0x1ca   : > { %1602 = vrot.lane.b32.xlu0 %v2788_v21, %s2870_s13  ;;  %v2789_v32 = vld [vmem:[#allocation3 + $0x38] ss:$8 sps:$4 sm:$0xff]   ;;  %v1681_v34 = vrot.slane %v1680_v33, 4  ;;  %v1930_v35 = vrot.slane %v1928_v7, 4  ;;  %v1933_v36 = vrot.slane %v1931_v12, 5  ;;  %v3358_v37 = vrot.slane %v1937_v14, 5 }
 0x1cb   : > { %v1658_v38 = vsel %vm2982_vm2, %v1653_v24, %v1657_v16  ;;  %v1672_v39 = vsel %vm2982_vm2, %v1667_v27, %v1671_v28  ;;  %v1942_v40 = vshrl.u32 %v1913_v62, 16  ;;  %v1945_v41 = vshll.u32 %v1913_v62, 16  ;;  %v1323_v42 = vld [vmem:[#allocation3 + $0x18] sm:$0xf]  ;;  %v1324_v45 = vld [vmem:[#allocation3 + $0x1c] sm:$0x1] }
 0x1cc   : > { %1604 = vrot.lane.b32.xlu1 %v2789_v32, %s2870_s13  ;;  %v2790_v46 = vld [vmem:[#allocation3 + $0x30] ss:$8 sps:$4 sm:$0xff]   ;;  %v2791_v48 = vld [vmem:[#allocation3 + $0x40] ss:$8 sps:$4 sm:$0xff]   ;;  %v2591_v49 = vcombine.low %v1644_v8, %v1658_v38  ;;  %v1686_v50 = vsel %vm2982_vm2, %v1681_v34, %v1685_v30  ;;  %v1934_v52 = vor.u32 %v1933_v36, %v1930_v35  ;;  %v1951_v53 = vshll.u32 %v1914_v19, 16  ;;  %s2651_s13 = sshll.u32 %s2927_s19, 10 }
 0x1cd   : > { %v2072_v54 = vld [vmem:[#allocation3 + $0x20] sm:$0xe]  ;;  %v2592_v55 = vcombine.low %v1672_v39, %v1686_v50  ;;  %v1944_v56 = vrot.slane %v1942_v40, 4  ;;  %v1947_v57 = vrot.slane %v1945_v41, 5  ;;  %v1362_v43 = vshrl.u32 %v1321_v23, 16  ;;  %v2795_v35 = vld [vmem:[%s3610_s2 + $0x8] sm:$0xff]   ;;  %s3554_s27 = scalar_lea.hbm %s3612_s4, %s2651_s13 }
 0x1ce   : > { %v2073_v26 = vld [vmem:[#allocation3 + $0x24] sm:$0x1]  ;;  %v2074_v58 = vld [vmem:[#allocation3 + $0x28] sm:$0xe]  ;;  %1898 = vrot.lane.b32.xlu0 %v2790_v46, %s2875_s6  ;;  %v1935_v59 = vrot.slane %v1934_v52, 4  ;;  %v1953_v60 = vrot.slane %v1951_v53, 5 }
 0x1cf   : > { %v1365_v61 = vshll.u32 %v1321_v23, 16  ;;  %v1371_v0 = vshll.u32 %v1322_v31, 16  ;;  %v2075_v47 = vld [vmem:[#allocation3 + $0x2c] sm:$0x1]  ;;  %v1948_v17 = vor.u32 %v1947_v57, %v1944_v56  ;;  %v1364_v2 = vrot.slane %v1362_v43, 4  ;;  %v2794_v62 = vld [vmem:[%s3610_s2] sm:$0xff]  }
 0x1d0   : > { %v1376_v4 = vshrl.u32 %v1323_v42, 16  ;;  %v1379_v7 = vshll.u32 %v1323_v42, 16  ;;  %v1784_v10 = vld [vmem:[#allocation3 + $0x38] sm:$0xe]  ;;  %1900 = vrot.lane.b32.xlu1 %v2791_v48, %s2875_s6  ;;  %v1940_v11 = vsel %vm2982_vm2, %v1935_v59, %v3358_v37  ;;  %v1385_v15 = vshll.u32 %v1324_v45, 16  ;;  %2682 = vmatprep.subr.bf16.mxu1 %v2794_v62  ;;  %s188_s6 = sand.u32 1, %s2855_s16  }
 0x1d1   : > { %v1367_v12 = vrot.slane %v1365_v61, 5  ;;  %v1373_v14 = vrot.slane %v1371_v0, 5  ;;  %v1785_v33 = vld [vmem:[#allocation3 + $0x3c] sm:$0x1]  ;;  %v1949_v16 = vrot.slane %v1948_v17, 4  ;;  %v2617_v8 = vrot.slane %v2072_v54, 9  ;;  %2683 = vmatpush3.bf16.msra.mxu1 %v2794_v62 }
 0x1d2   : > { %v1378_v19 = vrot.slane %v1376_v4, 4  ;;  %v1381_v21 = vrot.slane %v1379_v7, 5  ;;  %v1786_v23 = vld [vmem:[#allocation3 + $0x40] sm:$0xe]  ;;  %1755 = vrot.lane.b32.xlu0 %v2591_v49, %s2872_s23  ;;  %v1387_v28 = vrot.slane %v1385_v15, 5  ;;  %v2110_v30 = vrot.slane %v2073_v26, 5  ;;  %2684 = vmatprep.subr.bf16.mxu1 %v2795_v35 }
 0x1d3   : > { %v3375_v24 = vld [vmem:[#allocation3 + $0x20] sm:$0xe]  ;;  %v1368_v27 = vor.u32 %v1367_v12, %v1364_v2  ;;  %v2618_v31 = vrot.slane %v2074_v58, 9  ;;  %v1787_v32 = vld [vmem:[#allocation3 + $0x44] sm:$0x1]  ;;  %v1954_v36 = vsel %vm2982_vm2, %v1949_v16, %v1953_v60  ;;  %v2114_v38 = vrot.slane %v2075_v47, 5 }
 0x1d4   : > { %v1483_v34 = vld [vmem:[#allocation3 + $0x24] sm:$0x1]  ;;  %v1382_v37 = vor.u32 %v1381_v21, %v1378_v19  ;;  %v2601_v39 = vrot.slane %v1784_v10, 9  ;;  %v1484_v40 = vld [vmem:[#allocation3 + $0x28] sm:$0xe]  ;;  %1757 = vrot.lane.b32.xlu1 %v2592_v55, %s2872_s23  ;;  %v2611_v42 = vcombine.low %v1940_v11, %v1954_v36  ;;  %v2111_v46 = vsel %vm3254_vm8, %v2617_v8, %v2110_v30  ;;  %v2796_v55 = vld [vmem:[%s3610_s2 + $0x10] sm:$0xff]  }
 0x1d5   : > { %v1485_v41 = vld [vmem:[#allocation3 + $0x2c] sm:$0x1]  ;;  %v1369_v45 = vrot.slane %v1368_v27, 4  ;;  %v1830_v48 = vrot.slane %v1785_v33, 5  ;;  %v1486_v49 = vld [vmem:[#allocation3 + $0x30] sm:$0xe]  ;;  %v2115_v53 = vsel %vm3254_vm8, %v2618_v31, %v2114_v38  ;;  %v2032_v61 = vor.u32 %v3352_v18, %v3347_v51  ;;  %2685 = vmatpush3.bf16.msra.mxu1 %v2795_v35 }
 0x1d6   : > { %v1487_v50 = vld [vmem:[#allocation3 + $0x34] sm:$0x1]  ;;  %v1383_v52 = vrot.slane %v1382_v37, 4  ;;  %v2602_v54 = vrot.slane %v1786_v23, 9  ;;  %v1834_v56 = vrot.slane %v1787_v32, 5  ;;  %2051 = vrot.lane.b32.xlu0 %v2611_v42, %s2877_s22  ;;  %v2624_v26 = vcombine.low %v2111_v46, %v2115_v53  ;;  %2686 = vmatprep.subr.bf16.mxu1 %v2796_v55  ;;  %s2441_s11 = sshll.u32 %s188_s6, 6 }
 0x1d7   : > { %v1488_v57 = vld [vmem:[#allocation3 + $0x38] sm:$0xe]  ;;  %v1374_v43 = vsel %vm2982_vm2, %v1369_v45, %v1373_v14  ;;  %v2579_v58 = vrot.slane %v3375_v24, 9  ;;  %v1489_v59 = vld [vmem:[#allocation3 + $0x3c] sm:$0x1]  ;;  %v1527_v17 = vrot.slane %v1483_v34, 5  ;;  %v1831_v11 = vsel %vm3254_vm8, %v2601_v39, %v1830_v48 }
 0x1d8   : > { %v1780_v60 = vld [vmem:[#allocation3 + $0x28] sm:$0xe]  ;;  %v1388_v0 = vsel %vm2982_vm2, %v1383_v52, %v1387_v28  ;;  %v1835_v47 = vsel %vm3254_vm8, %v2602_v54, %v1834_v56  ;;  %v2580_v2 = vrot.slane %v1484_v40, 9  ;;  %v1781_v4 = vld [vmem:[#allocation3 + $0x2c] sm:$0x1]  ;;  %v1531_v12 = vrot.slane %v1485_v41, 5 }
 0x1d9   : > { %v1782_v7 = vld [vmem:[#allocation3 + $0x30] sm:$0xe]  ;;  %v2572_v10 = vcombine.low %v1374_v43, %v1388_v0  ;;  %v2581_v14 = vrot.slane %v1486_v49, 9  ;;  %v1783_v15 = vld [vmem:[#allocation3 + $0x34] sm:$0x1]  ;;  %v2606_v62 = vcombine.low %v1831_v11, %v1835_v47  ;;  %v1535_v16 = vrot.slane %v1487_v50, 5  ;;  %2687 = vmatpush3.bf16.msra.mxu1 %v2796_v55 }
 0x1da   : > { %v1915_v33 = vld [vmem:[#allocation3 + $0x20] sm:$0xf]  ;;  %v2582_v19 = vrot.slane %v1488_v57, 9  ;;  %v1539_v21 = vrot.slane %v1489_v59, 5  ;;  %v1916_v8 = vld [vmem:[#allocation3 + $0x24] sm:$0x1]  ;;  %2146 = vrot.lane.b32.xlu0 %v2624_v26, %s2876_s7  ;;  %v1532_v23 = vsel %vm3254_vm8, %v2580_v2, %v1531_v12  ;;  %v1528_v31 = vsel %vm3254_vm8, %v2579_v58, %v1527_v17 }
 0x1db   : > { %1459 = vrot.lane.b32.xlu1 %v2572_v10, %s2868_s9  ;;  %v2599_v24 = vrot.slane %v1780_v60, 9  ;;  %v1822_v27 = vrot.slane %v1781_v4, 5  ;;  %v2600_v28 = vrot.slane %v1782_v7, 9  ;;  %v1917_v30 = vld [vmem:[#allocation3 + $0x28] sm:$0xf]  ;;  %v1536_v32 = vsel %vm3254_vm8, %v2581_v14, %v1535_v16  ;;  %v2797_v50 = vld [vmem:[%s3610_s2 + $0x18] sm:$0xff]  }
 0x1dc   : > { %v1540_v34 = vsel %vm3254_vm8, %v2582_v19, %v1539_v21  ;;  %v1826_v35 = vrot.slane %v1783_v15, 5  ;;  %v1918_v36 = vld [vmem:[#allocation3 + $0x2c] sm:$0x1]  ;;  %v2585_v37 = vcombine.low %v1528_v31, %v1532_v23  ;;  %v1956_v39 = vshrl.u32 %v1915_v33, 16  ;;  %v1623_v41 = vld [vmem:[#allocation3 + $0x28] sm:$0xf]  ;;  %2688 = vmatprep.subr.bf16.mxu1 %v2797_v50 }
 0x1dd   : > { %v2586_v38 = vcombine.low %v1536_v32, %v1540_v34  ;;  %v1959_v40 = vshll.u32 %v1915_v33, 16  ;;  %v1965_v45 = vshll.u32 %v1916_v8, 16  ;;  %v1970_v46 = vshrl.u32 %v1917_v30, 16  ;;  %v1624_v49 = vld [vmem:[#allocation3 + $0x2c] sm:$0x1]  ;;  %2689 = vmatpush3.bf16.msra.mxu1 %v2797_v50  ;;  %s3537_s12 = scalar_lea.vmem [#allocation5], %s2441_s11 }
 0x1de   : > { %v1827_v42 = vsel %vm3254_vm8, %v2600_v28, %v1826_v35  ;;  %v1973_v48 = vshll.u32 %v1917_v30, 16  ;;  %1557 = vrot.lane.b32.xlu0 %v2585_v37, %s2867_s8  ;;  %v1823_v52 = vsel %vm3254_vm8, %v2599_v24, %v1822_v27  ;;  %v1958_v53 = vrot.slane %v1956_v39, 4  ;;  %v1625_v57 = vld [vmem:[#allocation3 + $0x30] sm:$0xf]  ;;  %v1626_v58 = vld [vmem:[#allocation3 + $0x34] sm:$0x1] }
 0x1df   : > { %1854 = vrot.lane.b32.xlu1 %v2606_v62, %s2874_s5  ;;  %v1961_v54 = vrot.slane %v1959_v40, 5  ;;  %v1979_v56 = vshll.u32 %v1918_v36, 16  ;;  %v2605_v55 = vcombine.low %v1823_v52, %v1827_v42  ;;  %v1972_v43 = vrot.slane %v1970_v46, 4  ;;  %v1325_v2 = vld [vmem:[#allocation3 + $0x20] sm:$0xf]  ;;  %s2375_s14 = sshll.u32 %s3537_s12, 4  ;;  %s3558_s14 = int_to_ptr.vmem [resolvable:$true] %s2375_s14 }
 0x1e0   : > { %v1975_v26 = vrot.slane %v1973_v48, 5  ;;  %v1688_v59 = vshrl.u32 %v1623_v41, 16  ;;  %v1967_v0 = vrot.slane %v1965_v45, 5  ;;  %v1691_v47 = vshll.u32 %v1623_v41, 16  ;;  %v1326_v62 = vld [vmem:[#allocation3 + $0x24] sm:$0x1] }
 0x1e1   : > { %v1962_v60 = vor.u32 %v1961_v54, %v1958_v53  ;;  %v1697_v17 = vshll.u32 %v1624_v49, 16  ;;  %v1702_v10 = vshrl.u32 %v1625_v57, 16  ;;  %v1705_v11 = vshll.u32 %v1625_v57, 16  ;;  %v1327_v8 = vld [vmem:[#allocation3 + $0x28] sm:$0xf]  ;;  %s3566_s19 = scalar_lea.sflag [#allocation6], %s188_s6 }
 0x1e2   : > { %v1976_v4 = vor.u32 %v1975_v26, %v1972_v43  ;;  %v1690_v7 = vrot.slane %v1688_v59, 4  ;;  %1852 = vrot.lane.b32.xlu0 %v2605_v55, %s2874_s5  ;;  %v1981_v14 = vrot.slane %v1979_v56, 5  ;;  %v1693_v15 = vrot.slane %v1691_v47, 5  ;;  %v1328_v34 = vld [vmem:[#allocation3 + $0x2c] sm:$0x1]  ;;  %s2878_s5 = smov 120  }
 0x1e3   : > { %1559 = vrot.lane.b32.xlu1 %v2586_v38, %s2867_s8  ;;  %v1963_v12 = vrot.slane %v1962_v60, 4  ;;  %v1711_v33 = vshll.u32 %v1626_v58, 16  ;;  %v1704_v19 = vrot.slane %v1702_v10, 4  ;;  %v1707_v21 = vrot.slane %v1705_v11, 5  ;;  %v1919_v37 = vld [vmem:[#allocation3 + $0x30] sm:$0xf] }
 0x1e4   : > { %v1977_v16 = vrot.slane %v1976_v4, 4  ;;  %v1390_v23 = vshrl.u32 %v1325_v2, 16  ;;  %v1694_v27 = vor.u32 %v1693_v15, %v1690_v7  ;;  %v1699_v28 = vrot.slane %v1697_v17, 5  ;;  %v1920_v42 = vld [vmem:[#allocation3 + $0x34] sm:$0x1]  ;;  %s2801_s28 = scalar_lea.vmem %s3558_s14, 1024 }
 0x1e5   : > { %v1968_v24 = vsel %vm2982_vm2, %v1963_v12, %v1967_v0  ;;  %v1393_v30 = vshll.u32 %v1325_v2, 16  ;;  %v1708_v32 = vor.u32 %v1707_v21, %v1704_v19  ;;  %v1399_v36 = vshll.u32 %v1326_v62, 16  ;;  %v1921_v50 = vld [vmem:[#allocation3 + $0x38] sm:$0xf]  ;;  %v1922_v56 = vld [vmem:[#allocation3 + $0x3c] sm:$0x1]  ;;  %p2802_p11 = scmp.ne.s32.totalorder %s3558_s14, %s2801_s28 }
 0x1e6   : > { %v1982_v31 = vsel %vm2982_vm2, %v1977_v16, %v1981_v14  ;;  %v1392_v35 = vrot.slane %v1390_v23, 4  ;;  %v1695_v39 = vrot.slane %v1694_v27, 4  ;;  %v1404_v41 = vshrl.u32 %v1327_v8, 16  ;;  %v1627_v59 = vld [vmem:[#allocation3 + $0x38] sm:$0xf]  ;;  %s2879_s8 = smov [#allocation5]  }
 0x1e7   : > { %v2612_v38 = vcombine.low %v1968_v24, %v1982_v31  ;;  %v1395_v40 = vrot.slane %v1393_v30, 5  ;;  %v1709_v45 = vrot.slane %v1708_v32, 4  ;;  %v1713_v46 = vrot.slane %v1711_v33, 5  ;;  %v1628_v60 = vld [vmem:[#allocation3 + $0x3c] sm:$0x1]  ;;  %p2803_p12 = pnand %p2802_p11, %p2944_p5  ;;  %s2805_s29 = sshll.u32 %s2879_s8, 4  ;;  %s2806_s29 = int_to_ptr.vmem [resolvable:$false] %s2805_s29 }
 0x1e8   : > { %v1401_v48 = vrot.slane %v1399_v36, 5  ;;  %v1407_v49 = vshll.u32 %v1327_v8, 16  ;;  %v1406_v53 = vrot.slane %v1404_v41, 4  ;;  %v1413_v54 = vshll.u32 %v1328_v34, 16  ;;  %v1629_v4 = vld [vmem:[#allocation3 + $0x40] sm:$0xf]  ;;  %p2808_p0 = scmp.lt.s32.totalorder %s3558_s14, %s2806_s29 }
 0x1e9   : > { %2053 = vrot.lane.b32.xlu1 %v2612_v38, %s2877_s22  ;;  %v1396_v52 = vor.u32 %v1395_v40, %v1392_v35  ;;  %v1984_v57 = vshrl.u32 %v1919_v37, 16  ;;  %v1700_v55 = vsel %vm2982_vm2, %v1695_v39, %v1699_v28  ;;  %v1714_v43 = vsel %vm2982_vm2, %v1709_v45, %v1713_v46  ;;  %v2793_v14 = vld [vmem:[#allocation3 + $0x10] ss:$8 sps:$4 sm:$0xff]   ;;  %v1630_v16 = vld [vmem:[#allocation3 + $0x44] sm:$0x1]  ;;  %p2804_p13 = pneg %p2803_p12 }
 0x1ea   : > { %v1409_v26 = vrot.slane %v1407_v49, 5  ;;  %v1987_v58 = vshll.u32 %v1919_v37, 16  ;;  %v2593_v0 = vcombine.low %v1700_v55, %v1714_v43  ;;  %v1993_v2 = vshll.u32 %v1920_v42, 16  ;;  %v2076_v27 = vld [vmem:[#allocation3 + $0x30] sm:$0xe]  ;;  %1314 = vst.msk [vmem:[#allocation4 + $0x8] sm:$0xff] %vm1312_vm9, %v2793_v14 }
 0x1eb   : > { %v1397_v47 = vrot.slane %v1396_v52, 4  ;;  %v1986_v17 = vrot.slane %v1984_v57, 4  ;;  %v1998_v11 = vshrl.u32 %v1921_v50, 16  ;;  %v2001_v12 = vshll.u32 %v1921_v50, 16  ;;  %v2077_v28 = vld [vmem:[#allocation3 + $0x34] sm:$0x1] }
 0x1ec   : > { %v1410_v7 = vor.u32 %v1409_v26, %v1406_v53  ;;  %v1989_v10 = vrot.slane %v1987_v58, 5  ;;  %1759 = vrot.lane.b32.xlu0 %v2593_v0, %s2872_s23  ;;  %v1415_v33 = vrot.slane %v1413_v54, 5  ;;  %v2007_v62 = vshll.u32 %v1922_v56, 16  ;;  %v2078_v35 = vld [vmem:[#allocation3 + $0x38] sm:$0xe] }
 0x1ed   : > { %v1402_v15 = vsel %vm2982_vm2, %v1397_v47, %v1401_v48  ;;  %v1716_v19 = vshrl.u32 %v1627_v59, 16  ;;  %v2000_v23 = vrot.slane %v1998_v11, 4  ;;  %v2003_v24 = vrot.slane %v2001_v12, 5  ;;  %v2798_v36 = vld [vmem:[#allocation3 + $0x20] ss:$8 sps:$4 sm:$0xff]  }
 0x1ee   : > { %v1411_v21 = vrot.slane %v1410_v7, 4  ;;  %v1990_v8 = vor.u32 %v1989_v10, %v1986_v17  ;;  %v1995_v30 = vrot.slane %v1993_v2, 5  ;;  %v1719_v32 = vshll.u32 %v1627_v59, 16  ;;  %v2079_v41 = vld [vmem:[#allocation3 + $0x3c] sm:$0x1]  ;;  %1315 = vst.msk [vmem:[#allocation4 + $0x10] sm:$0xff] %vm1312_vm9, %v2798_v36 }
 0x1ef   : > { %v1718_v31 = vrot.slane %v1716_v19, 4  ;;  %v1725_v34 = vshll.u32 %v1628_v60, 16  ;;  %v2004_v39 = vor.u32 %v2003_v24, %v2000_v23  ;;  %v1730_v40 = vshrl.u32 %v1629_v4, 16  ;;  %v1329_v49 = vld [vmem:[#allocation3 + $0x30] sm:$0xf] }
 0x1f0   : > { %v1416_v37 = vsel %vm2982_vm2, %v1411_v21, %v1415_v33  ;;  %v1991_v38 = vrot.slane %v1990_v8, 4  ;;  %v2009_v45 = vrot.slane %v2007_v62, 5  ;;  %v1721_v46 = vrot.slane %v1719_v32, 5  ;;  %v2800_v56 = vld [vmem:[#allocation3 + $0x30] ss:$8 sps:$4 sm:$0xff]  }
 0x1f1   : > { %v2573_v42 = vcombine.low %v1402_v15, %v1416_v37  ;;  %v1733_v48 = vshll.u32 %v1629_v4, 16  ;;  %v2005_v52 = vrot.slane %v2004_v39, 4  ;;  %v1732_v53 = vrot.slane %v1730_v40, 4  ;;  %v1330_v58 = vld [vmem:[#allocation3 + $0x34] sm:$0x1]  ;;  %1316 = vst.msk [vmem:[#allocation4 + $0x18] sm:$0xff] %vm1312_vm9, %v2800_v56 }
 0x1f2   : > { %v1996_v50 = vsel %vm2982_vm2, %v1991_v38, %v1995_v30  ;;  %v1739_v54 = vshll.u32 %v1630_v16, 16  ;;  %v1722_v57 = vor.u32 %v1721_v46, %v1718_v31  ;;  %v2619_v43 = vrot.slane %v2076_v27, 9  ;;  %v1331_v17 = vld [vmem:[#allocation3 + $0x38] sm:$0xf]  ;;  %v1332_v11 = vld [vmem:[#allocation3 + $0x3c] sm:$0x1] }
 0x1f3   : > { %1461 = vrot.lane.b32.xlu1 %v2573_v42, %s2868_s9  ;;  %v1735_v55 = vrot.slane %v1733_v48, 5  ;;  %v2118_v26 = vrot.slane %v2077_v28, 5  ;;  %v2010_v59 = vsel %vm2982_vm2, %v2005_v52, %v2009_v45  ;;  %v1727_v60 = vrot.slane %v1725_v34, 5  ;;  %v1923_v62 = vld [vmem:[#allocation3 + $0x40] sm:$0xf] }
 0x1f4   : > { %v2620_v0 = vrot.slane %v2078_v35, 9  ;;  %v2122_v47 = vrot.slane %v2079_v41, 5  ;;  %v2613_v2 = vcombine.low %v1996_v50, %v2010_v59  ;;  %v1723_v4 = vrot.slane %v1722_v57, 4  ;;  %v1924_v34 = vld [vmem:[#allocation3 + $0x44] sm:$0x1] }
 0x1f5   : > { %v1736_v7 = vor.u32 %v1735_v55, %v1732_v53  ;;  %v2119_v10 = vsel %vm3254_vm8, %v2619_v43, %v2118_v26  ;;  %v1741_v12 = vrot.slane %v1739_v54, 5  ;;  %v1418_v15 = vshrl.u32 %v1329_v49, 16  ;;  %v2637_v46 = vld [vmem:[%s3611_s3 + $0x2] ss:$0 sm:$0xff]  ;;  %v2082_v53 = vld [vmem:[#allocation3 + $0x48] sm:$0xe] }
 0x1f6   : > { %v2123_v14 = vsel %vm3254_vm8, %v2620_v0, %v2122_v47  ;;  %v1421_v33 = vshll.u32 %v1329_v49, 16  ;;  %2055 = vrot.lane.b32.xlu0 %v2613_v2, %s2877_s22  ;;  %v1728_v16 = vsel %vm2982_vm2, %v1723_v4, %v1727_v60  ;;  %v1427_v21 = vshll.u32 %v1330_v58, 16  ;;  %v2083_v43 = vld [vmem:[#allocation3 + $0x4c] sm:$0x1]  ;;  %v2799_v26 = vld [vmem:[%s3610_s2 + $0x20] ss:$0 sps:$4 sm:$0xff]  }
 0x1f7   : > { %v1737_v19 = vrot.slane %v1736_v7, 4  ;;  %v1432_v8 = vshrl.u32 %v1331_v17, 16  ;;  %v2625_v23 = vcombine.low %v2119_v10, %v2123_v14  ;;  %v1420_v24 = vrot.slane %v1418_v15, 4  ;;  %v2080_v58 = vld [vmem:[#allocation3 + $0x40] sm:$0xe]  ;;  %2701 = vmatprep.subr.msk.bf16.mxu1 %vm2219_vm10, %v2799_v26 }
 0x1f8   : > { %v1423_v27 = vrot.slane %v1421_v33, 5  ;;  %v1435_v28 = vshll.u32 %v1331_v17, 16  ;;  %v1441_v32 = vshll.u32 %v1332_v11, 16  ;;  %v2012_v35 = vshrl.u32 %v1923_v62, 16  ;;  %v2081_v51 = vld [vmem:[#allocation3 + $0x44] sm:$0x1] }
 0x1f9   : > { %v1742_v30 = vsel %vm2982_vm2, %v1737_v19, %v1741_v12  ;;  %v1434_v31 = vrot.slane %v1432_v8, 4  ;;  %v2015_v39 = vshll.u32 %v1923_v62, 16  ;;  %v1429_v40 = vrot.slane %v1427_v21, 5 }
 0x1fa   : > { %v2594_v36 = vcombine.low %v1728_v16, %v1742_v30  ;;  %v1424_v37 = vor.u32 %v1423_v27, %v1420_v24  ;;  %v1437_v38 = vrot.slane %v1435_v28, 5  ;;  %2148 = vrot.lane.b32.xlu0 %v2625_v23, %s2876_s7  ;;  %v2014_v41 = vrot.slane %v2012_v35, 4 }
 0x1fb   : > { %v2017_v48 = vrot.slane %v2015_v39, 5  ;;  %v2021_v49 = vshll.u32 %v1924_v34, 16  ;;  %v2033_v50 = vrot.slane %v2032_v61, 4  ;;  %v2037_v52 = vrot.slane %v2035_v44, 5 }
 0x1fc   : > { %1761 = vrot.lane.b32.xlu1 %v2594_v36, %s2872_s23  ;;  %v1425_v42 = vrot.slane %v1424_v37, 4  ;;  %v1438_v45 = vor.u32 %v1437_v38, %v1434_v31  ;;  %v1443_v57 = vrot.slane %v1441_v32, 5  ;;  %v2622_v61 = vrot.slane %v2082_v53, 9  ;;  %s2807_s23 = scalar_lea.vmem %s2806_s29, 2048 }
 0x1fd   : > { %v2018_v55 = vor.u32 %v2017_v48, %v2014_v41  ;;  %v2023_v18 = vrot.slane %v2021_v49, 5  ;;  %v2038_v60 = vsel %vm2982_vm2, %v2033_v50, %v2037_v52  ;;  %v2130_v0 = vrot.slane %v2083_v43, 5  ;;  %p2809_p1 = scmp.lt.s32.totalorder %s2807_s23, %s2801_s28 }
 0x1fe   : > { %v1430_v54 = vsel %vm2982_vm2, %v1425_v42, %v1429_v40  ;;  %v1439_v56 = vrot.slane %v1438_v45, 4  ;;  %2294 = vrot.lane.b32.xlu0 %v2637_v46, %s2868_s9  ;;  %v2621_v17 = vrot.slane %v2080_v58, 9  ;;  %v2126_v2 = vrot.slane %v2081_v51, 5 }
 0x1ff   : > { %v2019_v44 = vrot.slane %v2018_v55, 4  ;;  %v2221_v4 = vsel %vm2219_vm10, %v2799_v26, 0  ;;  %v2131_v11 = vsel %vm3254_vm8, %v2622_v61, %v2130_v0  ;;  %vm2156_vm1 = vcmask 589312   ;;  %p2810_p2 = por %p2809_p1, %p2808_p0 }
 0x200   : > { %v1444_v22 = vsel %vm2982_vm2, %v1439_v56, %v1443_v57  ;;  %2691 = vmatpush3.bf16.msra.mxu1 %v2221_v4  ;;  %v2127_v10 = vsel %vm3254_vm8, %v2621_v17, %v2126_v2 }
 0x201   : > { %v2574_v59 = vcombine.low %v1430_v54, %v1444_v22  ;;  %v2024_v47 = vsel %vm2982_vm2, %v2019_v44, %v2023_v18  ;;  %v2626_v12 = vcombine.low %v2127_v10, %v2131_v11  ;;  %vm1469_vm2 = vcmask 130112   ;;  %v2627_v22 = vld [vmem:[%s3611_s3 + $0x1] ss:$0 sm:$0xff]  ;;  %p2811_p3 = pnand %p2810_p2, %p2804_p13 }
 0x202   : > { %v2614_v7 = vcombine.low %v2024_v47, %v2038_v60 }
 0x203   : > { %1463 = vrot.lane.b32.xlu1 %v2574_v59, %s2868_s9 }
 0x207   : > { %2057 = vrot.lane.b32.xlu1 %v2614_v7, %s2877_s22 }
 0x20b   : > { %2150 = vrot.lane.b32.xlu1 %v2626_v12, %s2876_s7 }
 0x21b   : > { %v1601_v62 = vpop.permute.xlu1 %1600 }
 0x21c   : > { %v1599_v29 = vpop.permute.xlu0 %1598 }
 0x220   : > { %v1895_v14 = vpop.permute.xlu0 %1894 }
 0x221   : > { %v1851_v21 = vpop.permute.xlu1 %1850 }
 0x224   : > { %v1554_v15 = vpop.permute.xlu0 %1553 }
 0x225   : > { %v1556_v9 = vpop.permute.xlu1 %1555 }
 0x228   : > { %v1849_v33 = vpop.permute.xlu0 %1848 }
 0x22c   : > { %v2145_v16 = vpop.permute.xlu0 %2144 }
 0x230   : > { %v1458_v19 = vpop.permute.xlu0 %1457 }
 0x231   : > { %1470 = vst.msk [vmem:[#allocation4] sm:$0xff] %vm1469_vm2, %v1458_v19 }
 0x232   : > { %1566 = vst.msk [vmem:[#allocation4] sm:$0xff] %vm1565_vm11, %v1554_v15 }
 0x233   : > { %1611 = vst.msk [vmem:[#allocation4] sm:$0xff] %vm1610_vm12, %v1599_v29 }
 0x23a   : > { %v1897_v8 = vpop.permute.xlu1 %1896 }
 0x23c   : > { %v1603_v23 = vpop.permute.xlu0 %1602 }
 0x23e   : > { %v1605_v24 = vpop.permute.xlu1 %1604 }
 0x240   : > { %v1899_v27 = vpop.permute.xlu0 %1898 }
 0x242   : > { %v3487_v28 = vpop.permute.xlu1 %1900 }
 0x244   : > { %v1756_v30 = vpop.permute.xlu0 %1755 }
 0x245   : > { %1768 = vst.msk [vmem:[#allocation4] sm:$0xff] %vm1767_vm13, %v1756_v30 }
 0x246   : > { %1861 = vst.msk [vmem:[#allocation4] sm:$0xff] %vm1860_vm14, %v1849_v33  ;;  %v1758_v31 = vpop.permute.xlu1 %1757 }
 0x247   : > { %1907 = vst.msk [vmem:[#allocation4] sm:$0xff] %vm1906_vm15, %v1895_v14 }
 0x248   : > { %v2052_v32 = vpop.permute.xlu0 %2051 }
 0x249   : > { %2064 = vst.msk [vmem:[#allocation4] sm:$0xff] %vm2063_vm0, %v2052_v32 }
 0x24a   : > { %2157 = vst.msk [vmem:[#allocation4] sm:$0xff] %vm2156_vm1, %v2145_v16 }
 0x24c   : > { %v2147_v35 = vpop.permute.xlu0 %2146 }
 0x24d   : > { %v1460_v34 = vpop.permute.xlu1 %1459 }
 0x24e   : > { %1471 = vst.msk [vmem:[#allocation4 + $0x8] sm:$0xff] %vm1469_vm2, %v1460_v34 }
 0x24f   : > { %1567 = vst.msk [vmem:[#allocation4 + $0x8] sm:$0xff] %vm1565_vm11, %v1556_v9 }
 0x250   : > { %1612 = vst.msk [vmem:[#allocation4 + $0x8] sm:$0xff] %vm1610_vm12, %v1601_v62  ;;  %v1558_v39 = vpop.permute.xlu0 %1557 }
 0x251   : > { %1769 = vst.msk [vmem:[#allocation4 + $0x8] sm:$0xff] %vm1767_vm13, %v1758_v31  ;;  %v1855_v36 = vpop.permute.xlu1 %1854  ;;  %v2161_v37 = vld [vmem:[#allocation4] sm:$0xff] }
 0x252   : > { %1862 = vst.msk [vmem:[#allocation4 + $0x8] sm:$0xff] %vm1860_vm14, %v1851_v21  ;;  %2692 = vmatprep.mubr.msk.bf16.mxu1 %vm2206_vm3, %v2161_v37 }
 0x253   : > { %1908 = vst.msk [vmem:[#allocation4 + $0x8] sm:$0xff] %vm1906_vm15, %v1897_v8 }
 0x254   : > { %v1853_v41 = vpop.permute.xlu0 %1852 }
 0x255   : > { %v1560_v38 = vpop.permute.xlu1 %1559 }
 0x25b   : > { %v2054_v40 = vpop.permute.xlu1 %2053 }
 0x25c   : > { %2065 = vst.msk [vmem:[#allocation4 + $0x8] sm:$0xff] %vm2063_vm0, %v2054_v40 }
 0x25d   : > { %2158 = vst.msk [vmem:[#allocation4 + $0x8] sm:$0xff] %vm2156_vm1, %v2147_v35 }
 0x25e   : > { %v1760_v42 = vpop.permute.xlu0 %1759 }
 0x264   : > { %v2162_v45 = vld [vmem:[#allocation4 + $0x8] sm:$0xff] }
 0x265   : > { %v1462_v46 = vpop.permute.xlu1 %1461  ;;  %2693 = vmatmul.mubr.msk.bf16.vlgmr.msra.gmra.mrb[0].mxu1 %vm2206_vm3, %v2162_v45 }
 0x266   : > { %1472 = vst.msk [vmem:[#allocation4 + $0x10] sm:$0xff] %vm1469_vm2, %v1462_v46 }
 0x267   : > { %1568 = vst.msk [vmem:[#allocation4 + $0x10] sm:$0xff] %vm1565_vm11, %v1558_v39 }
 0x268   : > { %1613 = vst.msk [vmem:[#allocation4 + $0x10] sm:$0xff] %vm1610_vm12, %v1603_v23  ;;  %v2056_v48 = vpop.permute.xlu0 %2055 }
 0x269   : > { %1770 = vst.msk [vmem:[#allocation4 + $0x10] sm:$0xff] %vm1767_vm13, %v1760_v42 }
 0x26a   : > { %1863 = vst.msk [vmem:[#allocation4 + $0x10] sm:$0xff] %vm1860_vm14, %v1853_v41 }
 0x26b   : > { %1909 = vst.msk [vmem:[#allocation4 + $0x10] sm:$0xff] %vm1906_vm15, %v1899_v27 }
 0x26c   : > { %2066 = vst.msk [vmem:[#allocation4 + $0x10] sm:$0xff] %vm2063_vm0, %v2056_v48  ;;  %v2149_v49 = vpop.permute.xlu0 %2148 }
 0x26d   : > { %2159 = vst.msk [vmem:[#allocation4 + $0x10] sm:$0xff] %vm2156_vm1, %v2149_v49 }
 0x26e   : > { %v1762_v50 = vpop.permute.xlu1 %1761 }
 0x270   : > { %v2295_v52 = vpop.permute.xlu0 %2294 }
 0x271   : > { %v2298_v53 = vadd.f32 %v2295_v52, %v3234_v6  ;;  %v2297_v54 = vadd.f32 %v2295_v52, %v3226_v1  ;;  %v2300_v55 = vadd.f32 %v3230_v3, %v2295_v52  ;;  %v2299_v43 = vadd.f32 %v3222_v63, %v2295_v52 }
 0x272   : > { %v2302_v6 = vadd.f32 %v2295_v52, %v3305_v25  ;;  %v2301_v26 = vadd.f32 %v2295_v52, %v3294_v13  ;;  %v2304_v3 = vadd.f32 %v3299_v20, %v2295_v52  ;;  %v2303_v58 = vadd.f32 %v3282_v5, %v2295_v52 }
 0x273   : > { %2315 = vrot.lane.b32.xlu0 %v2298_v53, %s2878_s5  ;;  %2313 = vrot.lane.b32.xlu1 %v2297_v54, %s2878_s5 }
 0x274   : > { %v2163_v57 = vld [vmem:[#allocation4 + $0x10] sm:$0xff] }
 0x275   : > { %v1464_v56 = vpop.permute.xlu1 %1463  ;;  %2696 = vmatprep.mubr.msk.bf16.mxu1 %vm2206_vm3, %v2163_v57 }
 0x276   : > { %1473 = vst.msk [vmem:[#allocation4 + $0x18] sm:$0xff] %vm1469_vm2, %v1464_v56 }
 0x277   : > { %1569 = vst.msk [vmem:[#allocation4 + $0x18] sm:$0xff] %vm1565_vm11, %v1560_v38  ;;  %2319 = vrot.lane.b32.xlu0 %v2300_v55, %s2878_s5  ;;  %2317 = vrot.lane.b32.xlu1 %v2299_v43, %s2878_s5 }
 0x278   : > { %1614 = vst.msk [vmem:[#allocation4 + $0x18] sm:$0xff] %vm1610_vm12, %v1605_v24 }
 0x279   : > { %1771 = vst.msk [vmem:[#allocation4 + $0x18] sm:$0xff] %vm1767_vm13, %v1762_v50  ;;  %v2058_v1 = vpop.permute.xlu1 %2057 }
 0x27a   : > { %1864 = vst.msk [vmem:[#allocation4 + $0x18] sm:$0xff] %vm1860_vm14, %v1855_v36 }
 0x27b   : > { %1910 = vst.msk [vmem:[#allocation4 + $0x18] sm:$0xff] %vm1906_vm15, %v3487_v28  ;;  %2323 = vrot.lane.b32.xlu0 %v2302_v6, %s2878_s5  ;;  %2321 = vrot.lane.b32.xlu1 %v2301_v26, %s2878_s5 }
 0x27c   : > { %2067 = vst.msk [vmem:[#allocation4 + $0x18] sm:$0xff] %vm2063_vm0, %v2058_v1 }
 0x27d   : > { %v2151_v63 = vpop.permute.xlu1 %2150 }
 0x27e   : > { %2160 = vst.msk [vmem:[#allocation4 + $0x18] sm:$0xff] %vm2156_vm1, %v2151_v63 }
 0x27f   : > { %2327 = vrot.lane.b32.xlu0 %v2304_v3, %s2878_s5  ;;  %2325 = vrot.lane.b32.xlu1 %v2303_v58, %s2878_s5 }
 0x285   : > { %v2164_v25 = vld [vmem:[#allocation4 + $0x18] sm:$0xff] }
 0x286   : > { %2697 = vmatmul.mubr.msk.bf16.gmra.mrb[4].mxu1 %vm2206_vm3, %v2164_v25 }
 0x2e5   : > { %v2314_v13 = vpop.permute.xlu1 %2313  ;;  %v2316_v51 = vpop.permute.xlu0 %2315 }
 0x2e9   : > { %v2318_v20 = vpop.permute.xlu1 %2317  ;;  %v2320_v17 = vpop.permute.xlu0 %2319 }
 0x2ed   : > { %v2322_v15 = vpop.permute.xlu1 %2321  ;;  %v2324_v33 = vpop.permute.xlu0 %2323 }
 0x2f1   : > { %v2326_v21 = vpop.permute.xlu1 %2325  ;;  %v2328_v28 = vpop.permute.xlu0 %2327 }
 0x338   : > { %v2694_v44 = vpop.f32.mrb[0].mxu1 }
 0x339   : > { %v2266_v18 = vadd.f32 %v2694_v44, %v2627_v22  ;;  %v2257_v61 = vpop.f32.mrb[1].mxu1 }
 0x33a   : > { %v2258_v59 = vadd.f32 %v2627_v22, %v2257_v61  ;;  %v2695_v5 = vpop.f32.mrb[2].mxu1 }
 0x33b   : > { %v2339_v60 = vadd.f32 %v2318_v20, %v2266_v18  ;;  %v2269_v0 = vadd.f32 %v2695_v5, %v2627_v22  ;;  %v2260_v47 = vpop.f32.mrb[3].mxu1 }
 0x33c   : > { %v2337_v2 = vadd.f32 %v2314_v13, %v2258_v59  ;;  %v2261_v4 = vadd.f32 %v2627_v22, %v2260_v47 }
 0x33d   : > { %v2347_v7 = vmax.f32 %v2339_v60, 0.0  ;;  %v2340_v10 = vadd.f32 %v2320_v17, %v2269_v0 }
 0x33e   : > { %v2345_v11 = vmax.f32 %v2337_v2, 0.0  ;;  %v2338_v12 = vadd.f32 %v2316_v51, %v2261_v4 }
 0x33f   : > { %2355 = vst.msk [vmem:[%s3537_s12 + $0x10] sm:$0xff] %vm1312_vm9, %v2347_v7  ;;  %v2348_v29 = vmax.f32 %v2340_v10, 0.0 }
 0x340   : > { %2353 = vst.msk [vmem:[%s3537_s12] sm:$0xff] %vm1312_vm9, %v2345_v11  ;;  %v2346_v14 = vmax.f32 %v2338_v12, 0.0 }
 0x341   : > { %2356 = vst.msk [vmem:[%s3537_s12 + $0x18] sm:$0xff] %vm1312_vm9, %v2348_v29 }
 0x342   : > { %2354 = vst.msk [vmem:[%s3537_s12 + $0x8] sm:$0xff] %vm1312_vm9, %v2346_v14 }
 0x359   : > { %v2698_v62 = vpop.f32.mrb[4].mxu1 }
 0x35a   : > { %v2282_v16 = vadd.f32 %v2698_v62, %v2627_v22  ;;  %v2273_v19 = vpop.f32.mrb[5].mxu1 }
 0x35b   : > { %v2274_v9 = vadd.f32 %v2627_v22, %v2273_v19  ;;  %v2699_v8 = vpop.f32.mrb[6].mxu1 }
 0x35c   : > { %v2343_v23 = vadd.f32 %v2326_v21, %v2282_v16  ;;  %v2285_v24 = vadd.f32 %v2699_v8, %v2627_v22  ;;  %v2276_v27 = vpop.f32.mrb[7].mxu1 }
 0x35d   : > { %v2341_v30 = vadd.f32 %v2322_v15, %v2274_v9  ;;  %v2277_v31 = vadd.f32 %v2627_v22, %v2276_v27 }
 0x35e   : > { %v2351_v32 = vmax.f32 %v2343_v23, 0.0  ;;  %v2344_v34 = vadd.f32 %v2328_v28, %v2285_v24 }
 0x35f   : > { %v2349_v35 = vmax.f32 %v2341_v30, 0.0  ;;  %v2342_v36 = vadd.f32 %v2324_v33, %v2277_v31 }
 0x360   : > { %2359 = vst.msk [vmem:[%s3537_s12 + $0x30] sm:$0xff] %vm1312_vm9, %v2351_v32  ;;  %v2352_v37 = vmax.f32 %v2344_v34, 0.0 }
 0x361   : > { %2357 = vst.msk [vmem:[%s3537_s12 + $0x20] sm:$0xff] %vm1312_vm9, %v2349_v35  ;;  %v2350_v38 = vmax.f32 %v2342_v36, 0.0 }
 0x362   : > { %2360 = vst.msk [vmem:[%s3537_s12 + $0x38] sm:$0xff] %vm1312_vm9, %v2352_v37 }
 0x363   : > { %2358 = vst.msk [vmem:[%s3537_s12 + $0x28] sm:$0xff] %vm1312_vm9, %v2350_v38 }
 0x364   : > { %2814 = shalt.err (!%p2811_p3)
}
 0x365   : > { %s2815_s30 = scalar_lea.hbm %s3554_s27, 1024  ;;  %s2819_s7 = scalar_lea.hbm %s3612_s4, 2048 }
 0x366   : > { %p2816_p4 = scmp.ne.s32.totalorder %s3554_s27, %s2815_s30  ;;  %p2820_p9 = scmp.lt.u32.totalorder %s3554_s27, %s3612_s4 }
 0x367   : > { %p2821_p10 = scmp.lt.u32.totalorder %s2819_s7, %s2815_s30  ;;  %p2823_p12 = scmp.lt.u32.totalorder %s2815_s30, %s3554_s27 }
 0x368   : > { %p2817_p7 = pnand %p2816_p4, %p2944_p5 }
 0x369   : > { %p2822_p11 = por %p2821_p10, %p2820_p9 }
 0x36a   : > { %p2818_p8 = pneg %p2817_p7 }
 0x36b   : > { %p2824_p13 = por %p2823_p12, %p2822_p11 }
 0x36d   : > { %p2825_p0 = pnand %p2824_p13, %p2818_p8 }
 0x36f   : > { %2828 = shalt.err (!%p2825_p0)
}
 0x370   : > { %s2880_s12 = smov 128  }
 0x371   : > { %2703 = dma.vmem_to_hbm [thread:$0]  (%p2944_p5), %s3558_s14, 1024, %s3554_s27, %s3566_s19, %s2880_s12, %s2880_s12, %s2868_s9  }
 0x372 PF: > { %p2709_p1 = scmp.ge.s32.totalorder %s2863_s18, 2  ;;  %s2390_s13 = sand.u32 1, %s2851_s15  }
 0x373   : > { %s2391_s20 = scalar_lea.sflag [#allocation6], %s2390_s13 }
 0x374   : > { %p2706_p2 = pnand %p2709_p1, %p2948_p6 }
 0x376   : > { %2846 = dma.done.wait (!%p2706_p2), %s2391_s20, 1024  }
 0x377   : > { %2848 = vsyncadd (!%p2706_p2), %s2391_s20, 4294966272  ;;  %p14_p3 = scmp.ge.s32.totalorder %s2931_s21, 4   ;;  %s3625_s15 = smov %s2855_s16 }
 0x378   : > { %s3626_s16 = smov %s2859_s17  ;;  %s3627_s17 = smov %s2942_s24 }
 0x379   : > { %s3628_s18 = smov %s2931_s21  ;;  %16 = sbr.rel (!%p14_p3) target bundleno = 3 (0x3), region = 79 }
 0x380   :  { %2396 = vsyncpa [#allocation6], 1 }
 0x381   :  { %2398 = vsyncpa [#allocation6 + $0x1], 1 }

</bundles_post_ra>
